<compile_context>
chip_gen: v7x
topology: tpu7x:2x2x1
jax: 0.10.0
libtpu: 0.0.40
codegen_flags: <defaults>
</compile_context>

<pallas_src>
import functools

import jax
import jax.numpy as jnp
from jax.experimental import pallas as pl
from jax.experimental.pallas import tpu as pltpu

_VMEM = pl.BlockSpec(memory_space=pltpu.MemorySpace.VMEM)
_EPS = 1e-5


# ----------------------------- Pallas kernel --------------------------------

def _fused_conv_kernel(*refs, n_seg, relu, has_res, act):
    """Fused  out = act( norm(W @ cols + b) [+relu] [+residual] ).

    Ref layout (inputs then output):
      cols      (K, M)      bf16
      w         (Cout, K)   bf16
      b         (Cout, 1)   f32
      [seg_avg  (M, n_seg)  f32]   only if n_seg is not None and n_seg > 1
      [seg_bcast(n_seg, M)  f32]   only if n_seg is not None and n_seg > 1
      [res      (Cout, M)   f32]   only if has_res
      out       (Cout, M)   f32

    n_seg semantics: None = no norm, 1 = BatchNorm (stats over all M columns),
    >1 = InstanceNorm (stats per contiguous segment of M/n_seg columns).
    """
    it = iter(refs)
    cols_ref = next(it)
    w_ref = next(it)
    b_ref = next(it)
    seg_avg_ref = seg_bcast_ref = None
    if n_seg is not None and n_seg > 1:
        seg_avg_ref = next(it)
        seg_bcast_ref = next(it)
    res_ref = next(it) if has_res else None
    o_ref = next(it)

    # Lane-dense MXU matmul: big spatial dim (M) on the lane axis,
    # bf16 inputs, f32 accumulation.
    acc = jnp.dot(w_ref[...], cols_ref[...], preferred_element_type=jnp.float32)
    acc = acc + b_ref[...]                      # bias broadcast over lanes

    if n_seg is not None:
        if n_seg == 1:
            # BatchNorm2d (train mode, weight=1, bias=0): per-channel stats
            # over all (N, H, W) columns of this row.
            mean = jnp.mean(acc, axis=-1, keepdims=True)
            cent = acc - mean
            var = jnp.mean(cent * cent, axis=-1, keepdims=True)
        else:
            # InstanceNorm2d: per-(n, c) stats over each image's H*W segment.
            # Segment mean / var via two small MXU matmuls (stays full-width,
            # no in-kernel reshape / per-segment masked stores).
            seg_avg = seg_avg_ref[...]          # (M, n_seg), 1/Ms in segment
            seg_bcast = seg_bcast_ref[...]      # (n_seg, M), 0/1 indicator
            mean = jnp.dot(
                jnp.dot(acc, seg_avg, preferred_element_type=jnp.float32),
                seg_bcast, preferred_element_type=jnp.float32)
            cent = acc - mean
            var = jnp.dot(
                jnp.dot(cent * cent, seg_avg, preferred_element_type=jnp.float32),
                seg_bcast, preferred_element_type=jnp.float32)
        acc = cent * jax.lax.rsqrt(var + _EPS)

    if relu:
        acc = jnp.maximum(acc, 0.0)
    if has_res:
        acc = acc + res_ref[...]
    if act == "tanh":
        acc = jnp.tanh(acc)

    o_ref[...] = acc


def fused_conv(cols, wmat, bias, *, n_seg, relu=False, residual=None, act=None):
    """cols (K, M) , wmat (Cout, K), bias (Cout,) -> (Cout, M) f32."""
    K, M = cols.shape
    Cout = wmat.shape[0]
    inputs = [cols.astype(jnp.bfloat16),
              wmat.astype(jnp.bfloat16),
              bias.reshape(Cout, 1).astype(jnp.float32)]
    if n_seg is not None and n_seg > 1:
        ms = M // n_seg
        seg_id = jnp.arange(M, dtype=jnp.int32) // ms
        seg_bcast = (seg_id[None, :] ==
                     jnp.arange(n_seg, dtype=jnp.int32)[:, None]
                     ).astype(jnp.float32)                      # (n_seg, M)
        inputs += [seg_bcast.T * (1.0 / ms), seg_bcast]         # (M,n_seg),(n_seg,M)
    if residual is not None:
        inputs.append(residual.astype(jnp.float32))

    kernel = functools.partial(_fused_conv_kernel, n_seg=n_seg, relu=relu,
                               has_res=residual is not None, act=act)
    # TODO(synk): for realistic image sizes add an M-tiled grid
    # (parallel over M, two-pass stats) so cols never has to fit VMEM whole;
    # at these shapes the largest cols block is ~0.3 MB bf16, so one block
    # per call (auto VMEM residency, no pipeline) is optimal.
    return pl.pallas_call(
        kernel,
        out_shape=jax.ShapeDtypeStruct((Cout, M), jnp.float32),
        in_specs=[_VMEM] * len(inputs),
        out_specs=_VMEM,
        compiler_params=pltpu.CompilerParams(vmem_limit_bytes=32 * 1024 * 1024),
    )(*inputs)


# ------------------------------ JAX glue ops ---------------------------------
# Activations live in channel-major (C, N, H, W) layout between layers, so all
# reshapes below are flat (no transposes).

def _im2col_cnhw(x, kh, kw, stride):
    """x: (C, N, H, W) -> cols (C*kh*kw, N*Ho*Wo); row order = (c, kh, kw)."""
    # TODO(synk): pure data rearrangement kept in XLA (slices+stack+reshape);
    # an in-kernel im2col (shifted dots on a DMA'd tile) would cut the ~kh*kw
    # read amplification for large images.
    C, N, H, W = x.shape
    ho = (H - kh) // stride + 1
    wo = (W - kw) // stride + 1
    patches = []
    for i in range(kh):
        for j in range(kw):
            patches.append(
                x[:, :, i:i + stride * ho:stride, j:j + stride * wo:stride])
    p = jnp.stack(patches, axis=1)                   # (C, kh*kw, N, Ho, Wo)
    return p.reshape(C * kh * kw, N * ho * wo), (N, ho, wo)


def conv2d(x, w, b, stride=1, *, n_seg=None, relu=False, residual=None,
           act=None):
    """PyTorch-style Conv2d (padding=0) on (C, N, H, W) activations.

    w: (Cout, Cin, kh, kw), b: (Cout,).  Fully fused with norm/relu/res/tanh.
    """
    Cout, Cin, kh, kw = w.shape
    cols, (N, ho, wo) = _im2col_cnhw(x.astype(jnp.bfloat16), kh, kw, stride)
    out = fused_conv(cols, w.reshape(Cout, Cin * kh * kw), b,
                     n_seg=n_seg, relu=relu, residual=residual, act=act)
    return out.reshape(Cout, N, ho, wo)


def conv_transpose2d(x, w, stride, *, n_seg=None, relu=False, act=None):
    """PyTorch ConvTranspose2d, padding=0, bias=False, on (C, N, H, W).

    w: (Cin, Cout, kh, kw).
    """
    # TODO(synk): sub-pixel (stride^2 sub-conv) decomposition would avoid the
    # ~75% structural-zero MACs of this zero-dilated formulation at stride 2.
    Cin, Cout, kh, kw = w.shape
    C, N, H, W = x.shape
    if stride > 1:
        xd = jnp.zeros((C, N, (H - 1) * stride + 1, (W - 1) * stride + 1),
                       x.dtype)
        xd = xd.at[:, :, ::stride, ::stride].set(x)
    else:
        xd = x
    xp = jnp.pad(xd, ((0, 0), (0, 0), (kh - 1, kh - 1), (kw - 1, kw - 1)))
    # equivalent forward conv: flip kernel spatially, swap in/out channels
    weq = jnp.flip(w, axis=(-2, -1)).transpose(1, 0, 2, 3)   # (Cout,Cin,kh,kw)
    return conv2d(xp, weq, jnp.zeros((Cout,), jnp.float32), stride=1,
                  n_seg=n_seg, relu=relu, act=act)


def resnet_block(x, w1, w2):
    """ReflectPad1 -> Conv3x3 -> BN -> ReLU -> ReflectPad1 -> Conv3x3 -> BN, +x."""
    C, N, H, W = x.shape
    zero_b = jnp.zeros((w1.shape[0],), jnp.float32)
    h = jnp.pad(x, ((0, 0), (0, 0), (1, 1), (1, 1)), mode="reflect")
    h = conv2d(h, w1, zero_b, stride=1, n_seg=1, relu=True)       # conv+BN+ReLU
    h = jnp.pad(h, ((0, 0), (0, 0), (1, 1), (1, 1)), mode="reflect")
    h = conv2d(h, w2, zero_b, stride=1, n_seg=1, relu=False,      # conv+BN+res
               residual=x.reshape(C, N * H * W))
    return h


# -------------------------------- Generator ----------------------------------

def init_params(key, gen_input_nc, image_nc):
    ks = jax.random.split(key, 17)
    w = lambda k, s: 0.1 * jax.random.normal(k, s, jnp.float32)
    p = {
        # encoder (Conv2d, bias=True)
        "enc_w1": w(ks[0], (8, gen_input_nc, 3, 3)),  "enc_b1": w(ks[1], (8,)),
        "enc_w2": w(ks[2], (16, 8, 3, 3)),            "enc_b2": w(ks[3], (16,)),
        "enc_w3": w(ks[4], (32, 16, 3, 3)),           "enc_b3": w(ks[5], (32,)),
        # decoder (ConvTranspose2d weights are (Cin, Cout, kh, kw), bias=False)
        "dec_w1": w(ks[6], (32, 16, 3, 3)),
        "dec_w2": w(ks[7], (16, 8, 3, 3)),
        "dec_w3": w(ks[8], (8, image_nc, 6, 6)),
    }
    # 4 ResnetBlocks: two 3x3 convs each (bias=False) + BatchNorm (w=1, b=0)
    for i in range(4):
        p[f"res{i}_w1"] = w(ks[9 + 2 * i], (32, 32, 3, 3))
        p[f"res{i}_w2"] = w(ks[10 + 2 * i], (32, 32, 3, 3))
    return p


def generator_forward(x_nchw, params):
    # single layout change at entry: NCHW -> channel-major (C, N, H, W)
    x = x_nchw.transpose(1, 0, 2, 3)
    N = x.shape[1]
    # encoder: each layer = one fused conv + InstanceNorm + ReLU kernel
    h = conv2d(x, params["enc_w1"], params["enc_b1"], 1, n_seg=N, relu=True)
    h = conv2d(h, params["enc_w2"], params["enc_b2"], 2, n_seg=N, relu=True)
    h = conv2d(h, params["enc_w3"], params["enc_b3"], 2, n_seg=N, relu=True)
    # bottleneck: 4 ResnetBlocks, 2 fused kernels each
    for i in range(4):
        h = resnet_block(h, params[f"res{i}_w1"], params[f"res{i}_w2"])
    # decoder
    h = conv_transpose2d(h, params["dec_w1"], 2, n_seg=N, relu=True)
    h = conv_transpose2d(h, params["dec_w2"], 2, n_seg=N, relu=True)
    h = conv_transpose2d(h, params["dec_w3"], 1, n_seg=None, act="tanh")
    # single layout change at exit: back to NCHW
    return h.transpose(1, 0, 2, 3)


if __name__ == "__main__":
    key = jax.random.PRNGKey(0)
    gen_input_nc, image_nc = 4, 4
    pkey, xkey = jax.random.split(key)
    params = init_params(pkey, gen_input_nc, image_nc)
    x = jax.random.normal(xkey, (2, gen_input_nc, 16, 16), jnp.float32)

    out = jax.jit(generator_forward)(x, params)
    out = jax.block_until_ready(out)

    assert out.shape == (2, image_nc, 16, 16), out.shape
    assert bool(jnp.all(jnp.isfinite(out)))
    print("KERNEL_OK")
</pallas_src>

<mosaic_0001>
module attributes {stable_mosaic.version = 11 : i64} {
  func.func @_fused_conv_kernel(%arg0: memref<36x392xbf16, #tpu.memory_space<vmem>>, %arg1: memref<8x36xbf16, #tpu.memory_space<vmem>>, %arg2: memref<8x1xf32, #tpu.memory_space<vmem>>, %arg3: memref<392x2xf32, #tpu.memory_space<vmem>>, %arg4: memref<2x392xf32, #tpu.memory_space<vmem>>, %arg5: memref<8x392xf32, #tpu.memory_space<vmem>>) attributes {dimension_semantics = [], scalar_prefetch = 0 : i64, scratch_operands = 0 : i64, tpu.core_type = #tpu.core_type<tc>} {
    %c0 = arith.constant 0 : index
    %c0_0 = arith.constant 0 : index
    %0 = vector.load %arg1[%c0, %c0_0] : memref<8x36xbf16, #tpu.memory_space<vmem>>, vector<8x36xbf16>
    %c0_1 = arith.constant 0 : index
    %c0_2 = arith.constant 0 : index
    %1 = vector.load %arg0[%c0_1, %c0_2] : memref<36x392xbf16, #tpu.memory_space<vmem>>, vector<36x392xbf16>
    %cst = arith.constant dense<0.000000e+00> : vector<8x392xf32>
    %2 = tpu.matmul %0, %1, %cst {dimension_numbers = #tpu.dot_dimension_numbers<[1], [0], [0], [1], [0, 0, 1, 1], [], []>} : vector<8x36xbf16>, vector<36x392xbf16>, vector<8x392xf32> -> vector<8x392xf32>
    %c0_3 = arith.constant 0 : index
    %c0_4 = arith.constant 0 : index
    %3 = vector.load %arg2[%c0_3, %c0_4] : memref<8x1xf32, #tpu.memory_space<vmem>>, vector<8x1xf32>
    %4 = vector.broadcast %3 : vector<8x1xf32> to vector<8x392xf32>
    %5 = arith.addf %2, %4 : vector<8x392xf32>
    %c0_5 = arith.constant 0 : index
    %c0_6 = arith.constant 0 : index
    %6 = vector.load %arg3[%c0_5, %c0_6] : memref<392x2xf32, #tpu.memory_space<vmem>>, vector<392x2xf32>
    %c0_7 = arith.constant 0 : index
    %c0_8 = arith.constant 0 : index
    %7 = vector.load %arg4[%c0_7, %c0_8] : memref<2x392xf32, #tpu.memory_space<vmem>>, vector<2x392xf32>
    %cst_9 = arith.constant dense<0.000000e+00> : vector<8x2xf32>
    %8 = tpu.matmul %5, %6, %cst_9 {dimension_numbers = #tpu.dot_dimension_numbers<[1], [0], [0], [1], [0, 0, 1, 1], [], []>} : vector<8x392xf32>, vector<392x2xf32>, vector<8x2xf32> -> vector<8x2xf32>
    %cst_10 = arith.constant dense<0.000000e+00> : vector<8x392xf32>
    %9 = tpu.matmul %8, %7, %cst_10 {dimension_numbers = #tpu.dot_dimension_numbers<[1], [0], [0], [1], [0, 0, 1, 1], [], []>} : vector<8x2xf32>, vector<2x392xf32>, vector<8x392xf32> -> vector<8x392xf32>
    %10 = arith.subf %5, %9 : vector<8x392xf32>
    %11 = arith.mulf %10, %10 : vector<8x392xf32>
    %cst_11 = arith.constant dense<0.000000e+00> : vector<8x2xf32>
    %12 = tpu.matmul %11, %6, %cst_11 {dimension_numbers = #tpu.dot_dimension_numbers<[1], [0], [0], [1], [0, 0, 1, 1], [], []>} : vector<8x392xf32>, vector<392x2xf32>, vector<8x2xf32> -> vector<8x2xf32>
    %cst_12 = arith.constant dense<0.000000e+00> : vector<8x392xf32>
    %13 = tpu.matmul %12, %7, %cst_12 {dimension_numbers = #tpu.dot_dimension_numbers<[1], [0], [0], [1], [0, 0, 1, 1], [], []>} : vector<8x2xf32>, vector<2x392xf32>, vector<8x392xf32> -> vector<8x392xf32>
    %cst_13 = arith.constant 9.99999974E-6 : f32
    %14 = vector.broadcast %cst_13 : f32 to vector<8x392xf32>
    %15 = arith.addf %13, %14 : vector<8x392xf32>
    %16 = math.rsqrt %15 : vector<8x392xf32>
    %17 = arith.mulf %10, %16 : vector<8x392xf32>
    %cst_14 = arith.constant 0.000000e+00 : f32
    %18 = vector.broadcast %cst_14 : f32 to vector<8x392xf32>
    %19 = arith.maximumf %17, %18 : vector<8x392xf32>
    %c0_15 = arith.constant 0 : index
    %c0_16 = arith.constant 0 : index
    %20 = vector.load %arg5[%c0_15, %c0_16] : memref<8x392xf32, #tpu.memory_space<vmem>>, vector<8x392xf32>
    tpu.vector_store %arg5[%c0_15, %c0_16], %19 {strides = array<i32>} : memref<8x392xf32, #tpu.memory_space<vmem>>, vector<8x392xf32>,
    return
  }
}

module attributes {stable_mosaic.version = 11 : i64} {
  func.func @_fused_conv_kernel(%arg0: memref<72x72xbf16, #tpu.memory_space<vmem>>, %arg1: memref<16x72xbf16, #tpu.memory_space<vmem>>, %arg2: memref<16x1xf32, #tpu.memory_space<vmem>>, %arg3: memref<72x2xf32, #tpu.memory_space<vmem>>, %arg4: memref<2x72xf32, #tpu.memory_space<vmem>>, %arg5: memref<16x72xf32, #tpu.memory_space<vmem>>) attributes {dimension_semantics = [], scalar_prefetch = 0 : i64, scratch_operands = 0 : i64, tpu.core_type = #tpu.core_type<tc>} {
    %c0 = arith.constant 0 : index
    %c0_0 = arith.constant 0 : index
    %0 = vector.load %arg1[%c0, %c0_0] : memref<16x72xbf16, #tpu.memory_space<vmem>>, vector<16x72xbf16>
    %c0_1 = arith.constant 0 : index
    %c0_2 = arith.constant 0 : index
    %1 = vector.load %arg0[%c0_1, %c0_2] : memref<72x72xbf16, #tpu.memory_space<vmem>>, vector<72x72xbf16>
    %cst = arith.constant dense<0.000000e+00> : vector<16x72xf32>
    %2 = tpu.matmul %0, %1, %cst {dimension_numbers = #tpu.dot_dimension_numbers<[1], [0], [0], [1], [0, 0, 1, 1], [], []>} : vector<16x72xbf16>, vector<72x72xbf16>, vector<16x72xf32> -> vector<16x72xf32>
    %c0_3 = arith.constant 0 : index
    %c0_4 = arith.constant 0 : index
    %3 = vector.load %arg2[%c0_3, %c0_4] : memref<16x1xf32, #tpu.memory_space<vmem>>, vector<16x1xf32>
    %4 = vector.broadcast %3 : vector<16x1xf32> to vector<16x72xf32>
    %5 = arith.addf %2, %4 : vector<16x72xf32>
    %c0_5 = arith.constant 0 : index
    %c0_6 = arith.constant 0 : index
    %6 = vector.load %arg3[%c0_5, %c0_6] : memref<72x2xf32, #tpu.memory_space<vmem>>, vector<72x2xf32>
    %c0_7 = arith.constant 0 : index
    %c0_8 = arith.constant 0 : index
    %7 = vector.load %arg4[%c0_7, %c0_8] : memref<2x72xf32, #tpu.memory_space<vmem>>, vector<2x72xf32>
    %cst_9 = arith.constant dense<0.000000e+00> : vector<16x2xf32>
    %8 = tpu.matmul %5, %6, %cst_9 {dimension_numbers = #tpu.dot_dimension_numbers<[1], [0], [0], [1], [0, 0, 1, 1], [], []>} : vector<16x72xf32>, vector<72x2xf32>, vector<16x2xf32> -> vector<16x2xf32>
    %cst_10 = arith.constant dense<0.000000e+00> : vector<16x72xf32>
    %9 = tpu.matmul %8, %7, %cst_10 {dimension_numbers = #tpu.dot_dimension_numbers<[1], [0], [0], [1], [0, 0, 1, 1], [], []>} : vector<16x2xf32>, vector<2x72xf32>, vector<16x72xf32> -> vector<16x72xf32>
    %10 = arith.subf %5, %9 : vector<16x72xf32>
    %11 = arith.mulf %10, %10 : vector<16x72xf32>
    %cst_11 = arith.constant dense<0.000000e+00> : vector<16x2xf32>
    %12 = tpu.matmul %11, %6, %cst_11 {dimension_numbers = #tpu.dot_dimension_numbers<[1], [0], [0], [1], [0, 0, 1, 1], [], []>} : vector<16x72xf32>, vector<72x2xf32>, vector<16x2xf32> -> vector<16x2xf32>
    %cst_12 = arith.constant dense<0.000000e+00> : vector<16x72xf32>
    %13 = tpu.matmul %12, %7, %cst_12 {dimension_numbers = #tpu.dot_dimension_numbers<[1], [0], [0], [1], [0, 0, 1, 1], [], []>} : vector<16x2xf32>, vector<2x72xf32>, vector<16x72xf32> -> vector<16x72xf32>
    %cst_13 = arith.constant 9.99999974E-6 : f32
    %14 = vector.broadcast %cst_13 : f32 to vector<16x72xf32>
    %15 = arith.addf %13, %14 : vector<16x72xf32>
    %16 = math.rsqrt %15 : vector<16x72xf32>
    %17 = arith.mulf %10, %16 : vector<16x72xf32>
    %cst_14 = arith.constant 0.000000e+00 : f32
    %18 = vector.broadcast %cst_14 : f32 to vector<16x72xf32>
    %19 = arith.maximumf %17, %18 : vector<16x72xf32>
    %c0_15 = arith.constant 0 : index
    %c0_16 = arith.constant 0 : index
    %20 = vector.load %arg5[%c0_15, %c0_16] : memref<16x72xf32, #tpu.memory_space<vmem>>, vector<16x72xf32>
    tpu.vector_store %arg5[%c0_15, %c0_16], %19 {strides = array<i32>} : memref<16x72xf32, #tpu.memory_space<vmem>>, vector<16x72xf32>,
    return
  }
}

module attributes {stable_mosaic.version = 11 : i64} {
  func.func @_fused_conv_kernel(%arg0: memref<144x8xbf16, #tpu.memory_space<vmem>>, %arg1: memref<32x144xbf16, #tpu.memory_space<vmem>>, %arg2: memref<32x1xf32, #tpu.memory_space<vmem>>, %arg3: memref<8x2xf32, #tpu.memory_space<vmem>>, %arg4: memref<2x8xf32, #tpu.memory_space<vmem>>, %arg5: memref<32x8xf32, #tpu.memory_space<vmem>>) attributes {dimension_semantics = [], scalar_prefetch = 0 : i64, scratch_operands = 0 : i64, tpu.core_type = #tpu.core_type<tc>} {
    %c0 = arith.constant 0 : index
    %c0_0 = arith.constant 0 : index
    %0 = vector.load %arg1[%c0, %c0_0] : memref<32x144xbf16, #tpu.memory_space<vmem>>, vector<32x144xbf16>
    %c0_1 = arith.constant 0 : index
    %c0_2 = arith.constant 0 : index
    %1 = vector.load %arg0[%c0_1, %c0_2] : memref<144x8xbf16, #tpu.memory_space<vmem>>, vector<144x8xbf16>
    %cst = arith.constant dense<0.000000e+00> : vector<32x8xf32>
    %2 = tpu.matmul %0, %1, %cst {dimension_numbers = #tpu.dot_dimension_numbers<[1], [0], [0], [1], [0, 0, 1, 1], [], []>} : vector<32x144xbf16>, vector<144x8xbf16>, vector<32x8xf32> -> vector<32x8xf32>
    %c0_3 = arith.constant 0 : index
    %c0_4 = arith.constant 0 : index
    %3 = vector.load %arg2[%c0_3, %c0_4] : memref<32x1xf32, #tpu.memory_space<vmem>>, vector<32x1xf32>
    %4 = vector.broadcast %3 : vector<32x1xf32> to vector<32x8xf32>
    %5 = arith.addf %2, %4 : vector<32x8xf32>
    %c0_5 = arith.constant 0 : index
    %c0_6 = arith.constant 0 : index
    %6 = vector.load %arg3[%c0_5, %c0_6] : memref<8x2xf32, #tpu.memory_space<vmem>>, vector<8x2xf32>
    %c0_7 = arith.constant 0 : index
    %c0_8 = arith.constant 0 : index
    %7 = vector.load %arg4[%c0_7, %c0_8] : memref<2x8xf32, #tpu.memory_space<vmem>>, vector<2x8xf32>
    %cst_9 = arith.constant dense<0.000000e+00> : vector<32x2xf32>
    %8 = tpu.matmul %5, %6, %cst_9 {dimension_numbers = #tpu.dot_dimension_numbers<[1], [0], [0], [1], [0, 0, 1, 1], [], []>} : vector<32x8xf32>, vector<8x2xf32>, vector<32x2xf32> -> vector<32x2xf32>
    %cst_10 = arith.constant dense<0.000000e+00> : vector<32x8xf32>
    %9 = tpu.matmul %8, %7, %cst_10 {dimension_numbers = #tpu.dot_dimension_numbers<[1], [0], [0], [1], [0, 0, 1, 1], [], []>} : vector<32x2xf32>, vector<2x8xf32>, vector<32x8xf32> -> vector<32x8xf32>
    %10 = arith.subf %5, %9 : vector<32x8xf32>
    %11 = arith.mulf %10, %10 : vector<32x8xf32>
    %cst_11 = arith.constant dense<0.000000e+00> : vector<32x2xf32>
    %12 = tpu.matmul %11, %6, %cst_11 {dimension_numbers = #tpu.dot_dimension_numbers<[1], [0], [0], [1], [0, 0, 1, 1], [], []>} : vector<32x8xf32>, vector<8x2xf32>, vector<32x2xf32> -> vector<32x2xf32>
    %cst_12 = arith.constant dense<0.000000e+00> : vector<32x8xf32>
    %13 = tpu.matmul %12, %7, %cst_12 {dimension_numbers = #tpu.dot_dimension_numbers<[1], [0], [0], [1], [0, 0, 1, 1], [], []>} : vector<32x2xf32>, vector<2x8xf32>, vector<32x8xf32> -> vector<32x8xf32>
    %cst_13 = arith.constant 9.99999974E-6 : f32
    %14 = vector.broadcast %cst_13 : f32 to vector<32x8xf32>
    %15 = arith.addf %13, %14 : vector<32x8xf32>
    %16 = math.rsqrt %15 : vector<32x8xf32>
    %17 = arith.mulf %10, %16 : vector<32x8xf32>
    %cst_14 = arith.constant 0.000000e+00 : f32
    %18 = vector.broadcast %cst_14 : f32 to vector<32x8xf32>
    %19 = arith.maximumf %17, %18 : vector<32x8xf32>
    %c0_15 = arith.constant 0 : index
    %c0_16 = arith.constant 0 : index
    %20 = vector.load %arg5[%c0_15, %c0_16] : memref<32x8xf32, #tpu.memory_space<vmem>>, vector<32x8xf32>
    tpu.vector_store %arg5[%c0_15, %c0_16], %19 {strides = array<i32>} : memref<32x8xf32, #tpu.memory_space<vmem>>, vector<32x8xf32>,
    return
  }
}

module attributes {stable_mosaic.version = 11 : i64} {
  func.func @_fused_conv_kernel(%arg0: memref<288x8xbf16, #tpu.memory_space<vmem>>, %arg1: memref<32x288xbf16, #tpu.memory_space<vmem>>, %arg2: memref<32x1xf32, #tpu.memory_space<vmem>>, %arg3: memref<32x8xf32, #tpu.memory_space<vmem>>) attributes {dimension_semantics = [], scalar_prefetch = 0 : i64, scratch_operands = 0 : i64, tpu.core_type = #tpu.core_type<tc>} {
    %c0 = arith.constant 0 : index
    %c0_0 = arith.constant 0 : index
    %0 = vector.load %arg1[%c0, %c0_0] : memref<32x288xbf16, #tpu.memory_space<vmem>>, vector<32x288xbf16>
    %c0_1 = arith.constant 0 : index
    %c0_2 = arith.constant 0 : index
    %1 = vector.load %arg0[%c0_1, %c0_2] : memref<288x8xbf16, #tpu.memory_space<vmem>>, vector<288x8xbf16>
    %cst = arith.constant dense<0.000000e+00> : vector<32x8xf32>
    %2 = tpu.matmul %0, %1, %cst {dimension_numbers = #tpu.dot_dimension_numbers<[1], [0], [0], [1], [0, 0, 1, 1], [], []>} : vector<32x288xbf16>, vector<288x8xbf16>, vector<32x8xf32> -> vector<32x8xf32>
    %c0_3 = arith.constant 0 : index
    %c0_4 = arith.constant 0 : index
    %3 = vector.load %arg2[%c0_3, %c0_4] : memref<32x1xf32, #tpu.memory_space<vmem>>, vector<32x1xf32>
    %4 = vector.broadcast %3 : vector<32x1xf32> to vector<32x8xf32>
    %5 = arith.addf %2, %4 : vector<32x8xf32>
    %cst_5 = arith.constant dense<0.000000e+00> : vector<32xf32>
    %6 = vector.multi_reduction <add>, %5, %cst_5 [1] : vector<32x8xf32> to vector<32xf32>
    %7 = vector.shape_cast %6 : vector<32xf32> to vector<32x1xf32>
    %cst_6 = arith.constant 8.000000e+00 : f32
    %8 = vector.broadcast %cst_6 : f32 to vector<32x1xf32>
    %9 = arith.divf %7, %8 : vector<32x1xf32>
    %10 = vector.broadcast %9 : vector<32x1xf32> to vector<32x8xf32>
    %11 = arith.subf %5, %10 : vector<32x8xf32>
    %12 = arith.mulf %11, %11 : vector<32x8xf32>
    %cst_7 = arith.constant dense<0.000000e+00> : vector<32xf32>
    %13 = vector.multi_reduction <add>, %12, %cst_7 [1] : vector<32x8xf32> to vector<32xf32>
    %14 = vector.shape_cast %13 : vector<32xf32> to vector<32x1xf32>
    %cst_8 = arith.constant 8.000000e+00 : f32
    %15 = vector.broadcast %cst_8 : f32 to vector<32x1xf32>
    %16 = arith.divf %14, %15 : vector<32x1xf32>
    %cst_9 = arith.constant 9.99999974E-6 : f32
    %17 = vector.broadcast %cst_9 : f32 to vector<32x1xf32>
    %18 = arith.addf %16, %17 : vector<32x1xf32>
    %19 = math.rsqrt %18 : vector<32x1xf32>
    %20 = vector.broadcast %19 : vector<32x1xf32> to vector<32x8xf32>
    %21 = arith.mulf %11, %20 : vector<32x8xf32>
    %cst_10 = arith.constant 0.000000e+00 : f32
    %22 = vector.broadcast %cst_10 : f32 to vector<32x8xf32>
    %23 = arith.maximumf %21, %22 : vector<32x8xf32>
    %c0_11 = arith.constant 0 : index
    %c0_12 = arith.constant 0 : index
    %24 = vector.load %arg3[%c0_11, %c0_12] : memref<32x8xf32, #tpu.memory_space<vmem>>, vector<32x8xf32>
    tpu.vector_store %arg3[%c0_11, %c0_12], %23 {strides = array<i32>} : memref<32x8xf32, #tpu.memory_space<vmem>>, vector<32x8xf32>,
    return
  }
}

module attributes {stable_mosaic.version = 11 : i64} {
  func.func @_fused_conv_kernel(%arg0: memref<288x8xbf16, #tpu.memory_space<vmem>>, %arg1: memref<32x288xbf16, #tpu.memory_space<vmem>>, %arg2: memref<32x1xf32, #tpu.memory_space<vmem>>, %arg3: memref<32x8xf32, #tpu.memory_space<vmem>>, %arg4: memref<32x8xf32, #tpu.memory_space<vmem>>) attributes {dimension_semantics = [], scalar_prefetch = 0 : i64, scratch_operands = 0 : i64, tpu.core_type = #tpu.core_type<tc>} {
    %c0 = arith.constant 0 : index
    %c0_0 = arith.constant 0 : index
    %0 = vector.load %arg1[%c0, %c0_0] : memref<32x288xbf16, #tpu.memory_space<vmem>>, vector<32x288xbf16>
    %c0_1 = arith.constant 0 : index
    %c0_2 = arith.constant 0 : index
    %1 = vector.load %arg0[%c0_1, %c0_2] : memref<288x8xbf16, #tpu.memory_space<vmem>>, vector<288x8xbf16>
    %cst = arith.constant dense<0.000000e+00> : vector<32x8xf32>
    %2 = tpu.matmul %0, %1, %cst {dimension_numbers = #tpu.dot_dimension_numbers<[1], [0], [0], [1], [0, 0, 1, 1], [], []>} : vector<32x288xbf16>, vector<288x8xbf16>, vector<32x8xf32> -> vector<32x8xf32>
    %c0_3 = arith.constant 0 : index
    %c0_4 = arith.constant 0 : index
    %3 = vector.load %arg2[%c0_3, %c0_4] : memref<32x1xf32, #tpu.memory_space<vmem>>, vector<32x1xf32>
    %4 = vector.broadcast %3 : vector<32x1xf32> to vector<32x8xf32>
    %5 = arith.addf %2, %4 : vector<32x8xf32>
    %cst_5 = arith.constant dense<0.000000e+00> : vector<32xf32>
    %6 = vector.multi_reduction <add>, %5, %cst_5 [1] : vector<32x8xf32> to vector<32xf32>
    %7 = vector.shape_cast %6 : vector<32xf32> to vector<32x1xf32>
    %cst_6 = arith.constant 8.000000e+00 : f32
    %8 = vector.broadcast %cst_6 : f32 to vector<32x1xf32>
    %9 = arith.divf %7, %8 : vector<32x1xf32>
    %10 = vector.broadcast %9 : vector<32x1xf32> to vector<32x8xf32>
    %11 = arith.subf %5, %10 : vector<32x8xf32>
    %12 = arith.mulf %11, %11 : vector<32x8xf32>
    %cst_7 = arith.constant dense<0.000000e+00> : vector<32xf32>
    %13 = vector.multi_reduction <add>, %12, %cst_7 [1] : vector<32x8xf32> to vector<32xf32>
    %14 = vector.shape_cast %13 : vector<32xf32> to vector<32x1xf32>
    %cst_8 = arith.constant 8.000000e+00 : f32
    %15 = vector.broadcast %cst_8 : f32 to vector<32x1xf32>
    %16 = arith.divf %14, %15 : vector<32x1xf32>
    %cst_9 = arith.constant 9.99999974E-6 : f32
    %17 = vector.broadcast %cst_9 : f32 to vector<32x1xf32>
    %18 = arith.addf %16, %17 : vector<32x1xf32>
    %19 = math.rsqrt %18 : vector<32x1xf32>
    %20 = vector.broadcast %19 : vector<32x1xf32> to vector<32x8xf32>
    %21 = arith.mulf %11, %20 : vector<32x8xf32>
    %c0_10 = arith.constant 0 : index
    %c0_11 = arith.constant 0 : index
    %22 = vector.load %arg3[%c0_10, %c0_11] : memref<32x8xf32, #tpu.memory_space<vmem>>, vector<32x8xf32>
    %23 = arith.addf %21, %22 : vector<32x8xf32>
    %c0_12 = arith.constant 0 : index
    %c0_13 = arith.constant 0 : index
    %24 = vector.load %arg4[%c0_12, %c0_13] : memref<32x8xf32, #tpu.memory_space<vmem>>, vector<32x8xf32>
    tpu.vector_store %arg4[%c0_12, %c0_13], %23 {strides = array<i32>} : memref<32x8xf32, #tpu.memory_space<vmem>>, vector<32x8xf32>,
    return
  }
}

module attributes {stable_mosaic.version = 11 : i64} {
  func.func @_fused_conv_kernel(%arg0: memref<288x50xbf16, #tpu.memory_space<vmem>>, %arg1: memref<16x288xbf16, #tpu.memory_space<vmem>>, %arg2: memref<16x1xf32, #tpu.memory_space<vmem>>, %arg3: memref<50x2xf32, #tpu.memory_space<vmem>>, %arg4: memref<2x50xf32, #tpu.memory_space<vmem>>, %arg5: memref<16x50xf32, #tpu.memory_space<vmem>>) attributes {dimension_semantics = [], scalar_prefetch = 0 : i64, scratch_operands = 0 : i64, tpu.core_type = #tpu.core_type<tc>} {
    %c0 = arith.constant 0 : index
    %c0_0 = arith.constant 0 : index
    %0 = vector.load %arg1[%c0, %c0_0] : memref<16x288xbf16, #tpu.memory_space<vmem>>, vector<16x288xbf16>
    %c0_1 = arith.constant 0 : index
    %c0_2 = arith.constant 0 : index
    %1 = vector.load %arg0[%c0_1, %c0_2] : memref<288x50xbf16, #tpu.memory_space<vmem>>, vector<288x50xbf16>
    %cst = arith.constant dense<0.000000e+00> : vector<16x50xf32>
    %2 = tpu.matmul %0, %1, %cst {dimension_numbers = #tpu.dot_dimension_numbers<[1], [0], [0], [1], [0, 0, 1, 1], [], []>} : vector<16x288xbf16>, vector<288x50xbf16>, vector<16x50xf32> -> vector<16x50xf32>
    %c0_3 = arith.constant 0 : index
    %c0_4 = arith.constant 0 : index
    %3 = vector.load %arg2[%c0_3, %c0_4] : memref<16x1xf32, #tpu.memory_space<vmem>>, vector<16x1xf32>
    %4 = vector.broadcast %3 : vector<16x1xf32> to vector<16x50xf32>
    %5 = arith.addf %2, %4 : vector<16x50xf32>
    %c0_5 = arith.constant 0 : index
    %c0_6 = arith.constant 0 : index
    %6 = vector.load %arg3[%c0_5, %c0_6] : memref<50x2xf32, #tpu.memory_space<vmem>>, vector<50x2xf32>
    %c0_7 = arith.constant 0 : index
    %c0_8 = arith.constant 0 : index
    %7 = vector.load %arg4[%c0_7, %c0_8] : memref<2x50xf32, #tpu.memory_space<vmem>>, vector<2x50xf32>
    %cst_9 = arith.constant dense<0.000000e+00> : vector<16x2xf32>
    %8 = tpu.matmul %5, %6, %cst_9 {dimension_numbers = #tpu.dot_dimension_numbers<[1], [0], [0], [1], [0, 0, 1, 1], [], []>} : vector<16x50xf32>, vector<50x2xf32>, vector<16x2xf32> -> vector<16x2xf32>
    %cst_10 = arith.constant dense<0.000000e+00> : vector<16x50xf32>
    %9 = tpu.matmul %8, %7, %cst_10 {dimension_numbers = #tpu.dot_dimension_numbers<[1], [0], [0], [1], [0, 0, 1, 1], [], []>} : vector<16x2xf32>, vector<2x50xf32>, vector<16x50xf32> -> vector<16x50xf32>
    %10 = arith.subf %5, %9 : vector<16x50xf32>
    %11 = arith.mulf %10, %10 : vector<16x50xf32>
    %cst_11 = arith.constant dense<0.000000e+00> : vector<16x2xf32>
    %12 = tpu.matmul %11, %6, %cst_11 {dimension_numbers = #tpu.dot_dimension_numbers<[1], [0], [0], [1], [0, 0, 1, 1], [], []>} : vector<16x50xf32>, vector<50x2xf32>, vector<16x2xf32> -> vector<16x2xf32>
    %cst_12 = arith.constant dense<0.000000e+00> : vector<16x50xf32>
    %13 = tpu.matmul %12, %7, %cst_12 {dimension_numbers = #tpu.dot_dimension_numbers<[1], [0], [0], [1], [0, 0, 1, 1], [], []>} : vector<16x2xf32>, vector<2x50xf32>, vector<16x50xf32> -> vector<16x50xf32>
    %cst_13 = arith.constant 9.99999974E-6 : f32
    %14 = vector.broadcast %cst_13 : f32 to vector<16x50xf32>
    %15 = arith.addf %13, %14 : vector<16x50xf32>
    %16 = math.rsqrt %15 : vector<16x50xf32>
    %17 = arith.mulf %10, %16 : vector<16x50xf32>
    %cst_14 = arith.constant 0.000000e+00 : f32
    %18 = vector.broadcast %cst_14 : f32 to vector<16x50xf32>
    %19 = arith.maximumf %17, %18 : vector<16x50xf32>
    %c0_15 = arith.constant 0 : index
    %c0_16 = arith.constant 0 : index
    %20 = vector.load %arg5[%c0_15, %c0_16] : memref<16x50xf32, #tpu.memory_space<vmem>>, vector<16x50xf32>
    tpu.vector_store %arg5[%c0_15, %c0_16], %19 {strides = array<i32>} : memref<16x50xf32, #tpu.memory_space<vmem>>, vector<16x50xf32>,
    return
  }
}

module attributes {stable_mosaic.version = 11 : i64} {
  func.func @_fused_conv_kernel(%arg0: memref<144x242xbf16, #tpu.memory_space<vmem>>, %arg1: memref<8x144xbf16, #tpu.memory_space<vmem>>, %arg2: memref<8x1xf32, #tpu.memory_space<vmem>>, %arg3: memref<242x2xf32, #tpu.memory_space<vmem>>, %arg4: memref<2x242xf32, #tpu.memory_space<vmem>>, %arg5: memref<8x242xf32, #tpu.memory_space<vmem>>) attributes {dimension_semantics = [], scalar_prefetch = 0 : i64, scratch_operands = 0 : i64, tpu.core_type = #tpu.core_type<tc>} {
    %c0 = arith.constant 0 : index
    %c0_0 = arith.constant 0 : index
    %0 = vector.load %arg1[%c0, %c0_0] : memref<8x144xbf16, #tpu.memory_space<vmem>>, vector<8x144xbf16>
    %c0_1 = arith.constant 0 : index
    %c0_2 = arith.constant 0 : index
    %1 = vector.load %arg0[%c0_1, %c0_2] : memref<144x242xbf16, #tpu.memory_space<vmem>>, vector<144x242xbf16>
    %cst = arith.constant dense<0.000000e+00> : vector<8x242xf32>
    %2 = tpu.matmul %0, %1, %cst {dimension_numbers = #tpu.dot_dimension_numbers<[1], [0], [0], [1], [0, 0, 1, 1], [], []>} : vector<8x144xbf16>, vector<144x242xbf16>, vector<8x242xf32> -> vector<8x242xf32>
    %c0_3 = arith.constant 0 : index
    %c0_4 = arith.constant 0 : index
    %3 = vector.load %arg2[%c0_3, %c0_4] : memref<8x1xf32, #tpu.memory_space<vmem>>, vector<8x1xf32>
    %4 = vector.broadcast %3 : vector<8x1xf32> to vector<8x242xf32>
    %5 = arith.addf %2, %4 : vector<8x242xf32>
    %c0_5 = arith.constant 0 : index
    %c0_6 = arith.constant 0 : index
    %6 = vector.load %arg3[%c0_5, %c0_6] : memref<242x2xf32, #tpu.memory_space<vmem>>, vector<242x2xf32>
    %c0_7 = arith.constant 0 : index
    %c0_8 = arith.constant 0 : index
    %7 = vector.load %arg4[%c0_7, %c0_8] : memref<2x242xf32, #tpu.memory_space<vmem>>, vector<2x242xf32>
    %cst_9 = arith.constant dense<0.000000e+00> : vector<8x2xf32>
    %8 = tpu.matmul %5, %6, %cst_9 {dimension_numbers = #tpu.dot_dimension_numbers<[1], [0], [0], [1], [0, 0, 1, 1], [], []>} : vector<8x242xf32>, vector<242x2xf32>, vector<8x2xf32> -> vector<8x2xf32>
    %cst_10 = arith.constant dense<0.000000e+00> : vector<8x242xf32>
    %9 = tpu.matmul %8, %7, %cst_10 {dimension_numbers = #tpu.dot_dimension_numbers<[1], [0], [0], [1], [0, 0, 1, 1], [], []>} : vector<8x2xf32>, vector<2x242xf32>, vector<8x242xf32> -> vector<8x242xf32>
    %10 = arith.subf %5, %9 : vector<8x242xf32>
    %11 = arith.mulf %10, %10 : vector<8x242xf32>
    %cst_11 = arith.constant dense<0.000000e+00> : vector<8x2xf32>
    %12 = tpu.matmul %11, %6, %cst_11 {dimension_numbers = #tpu.dot_dimension_numbers<[1], [0], [0], [1], [0, 0, 1, 1], [], []>} : vector<8x242xf32>, vector<242x2xf32>, vector<8x2xf32> -> vector<8x2xf32>
    %cst_12 = arith.constant dense<0.000000e+00> : vector<8x242xf32>
    %13 = tpu.matmul %12, %7, %cst_12 {dimension_numbers = #tpu.dot_dimension_numbers<[1], [0], [0], [1], [0, 0, 1, 1], [], []>} : vector<8x2xf32>, vector<2x242xf32>, vector<8x242xf32> -> vector<8x242xf32>
    %cst_13 = arith.constant 9.99999974E-6 : f32
    %14 = vector.broadcast %cst_13 : f32 to vector<8x242xf32>
    %15 = arith.addf %13, %14 : vector<8x242xf32>
    %16 = math.rsqrt %15 : vector<8x242xf32>
    %17 = arith.mulf %10, %16 : vector<8x242xf32>
    %cst_14 = arith.constant 0.000000e+00 : f32
    %18 = vector.broadcast %cst_14 : f32 to vector<8x242xf32>
    %19 = arith.maximumf %17, %18 : vector<8x242xf32>
    %c0_15 = arith.constant 0 : index
    %c0_16 = arith.constant 0 : index
    %20 = vector.load %arg5[%c0_15, %c0_16] : memref<8x242xf32, #tpu.memory_space<vmem>>, vector<8x242xf32>
    tpu.vector_store %arg5[%c0_15, %c0_16], %19 {strides = array<i32>} : memref<8x242xf32, #tpu.memory_space<vmem>>, vector<8x242xf32>,
    return
  }
}

module attributes {stable_mosaic.version = 11 : i64} {
  func.func @_fused_conv_kernel(%arg0: memref<288x512xbf16, #tpu.memory_space<vmem>>, %arg1: memref<4x288xbf16, #tpu.memory_space<vmem>>, %arg2: memref<4x1xf32, #tpu.memory_space<vmem>>, %arg3: memref<4x512xf32, #tpu.memory_space<vmem>>) attributes {dimension_semantics = [], scalar_prefetch = 0 : i64, scratch_operands = 0 : i64, tpu.core_type = #tpu.core_type<tc>} {
    %c0 = arith.constant 0 : index
    %c0_0 = arith.constant 0 : index
    %0 = vector.load %arg1[%c0, %c0_0] : memref<4x288xbf16, #tpu.memory_space<vmem>>, vector<4x288xbf16>
    %c0_1 = arith.constant 0 : index
    %c0_2 = arith.constant 0 : index
    %1 = vector.load %arg0[%c0_1, %c0_2] : memref<288x512xbf16, #tpu.memory_space<vmem>>, vector<288x512xbf16>
    %cst = arith.constant dense<0.000000e+00> : vector<4x512xf32>
    %2 = tpu.matmul %0, %1, %cst {dimension_numbers = #tpu.dot_dimension_numbers<[1], [0], [0], [1], [0, 0, 1, 1], [], []>} : vector<4x288xbf16>, vector<288x512xbf16>, vector<4x512xf32> -> vector<4x512xf32>
    %c0_3 = arith.constant 0 : index
    %c0_4 = arith.constant 0 : index
    %3 = vector.load %arg2[%c0_3, %c0_4] : memref<4x1xf32, #tpu.memory_space<vmem>>, vector<4x1xf32>
    %4 = vector.broadcast %3 : vector<4x1xf32> to vector<4x512xf32>
    %5 = arith.addf %2, %4 : vector<4x512xf32>
    %6 = math.tanh %5 : vector<4x512xf32>
    %c0_5 = arith.constant 0 : index
    %c0_6 = arith.constant 0 : index
    %7 = vector.load %arg3[%c0_5, %c0_6] : memref<4x512xf32, #tpu.memory_space<vmem>>, vector<4x512xf32>
    tpu.vector_store %arg3[%c0_5, %c0_6], %6 {strides = array<i32>} : memref<4x512xf32, #tpu.memory_space<vmem>>, vector<4x512xf32>,
    return
  }
}

</mosaic_0001>

<bundles_post_ra>
// kernel: generator_forward.14
= control target key start
LH: loop header
LB: loop body
LE: loop exit
PB: predicated region body
PF: predicated region fallthrough
CT: control target
= control target key end

     0   :  { %v1111_v1 = vmov 0   ;;  %vm92_vm0 = vcmask 1041408   ;;  %vm88_vm1 = vcmask 293888   ;;  %v1112_v31 = vmov 0.0|0.0   ;;  %s1516_s0 = inlined_call_operand.vmem [shape: bf16[36,392], index: 0, kind: input, shape index: {}]   ;;  %s1517_s2 = inlined_call_operand.vmem [shape: f32[8,1], index: 2, kind: input, shape index: {}]   ;;  %s1518_s3 = inlined_call_operand.vmem [shape: f32[392,2], index: 3, kind: input, shape index: {}]   ;;  %s1519_s1 = inlined_call_operand.vmem [shape: bf16[8,36], index: 1, kind: input, shape index: {}]   ;;  %s1520_s4 = inlined_call_operand.vmem [shape: f32[2,392], index: 4, kind: input, shape index: {}]   ;;  %s1521_s5 = inlined_call_operand.vmem [shape: f32[8,392], index: 5, kind: output, shape index: {}]  }
   0x1   :  { %v1086_v0 = vld [vmem:[%s1516_s0 + $0x4] ss:$16 sps:$4 sm:$0xff]   ;;  %137 = vmatprep.mubr.bf16.mxu0 %v1111_v1  ;;  %178 = vmatprep.mubr.bf16.mxu1 %v1111_v1  ;;  %v1088_v2 = vld [vmem:[%s1516_s0 + $0xc] ss:$16 sps:$4 sm:$0xff]   ;;  %v1090_v3 = vld [vmem:[%s1516_s0] ss:$16 sps:$4 sm:$0xff]  }
   0x2   :  { %1085 = vset.pattern.permute.xlu0 %v1111_v1  ;;  %105 = vmatprep.subr.bf16.mxu0 %v1086_v0  ;;  %v1091_v4 = vld [vmem:[%s1516_s0 + $0x8] ss:$16 sps:$4 sm:$0xff]   ;;  %v1092_v5 = vld [vmem:[%s1516_s0 + $0x24] ss:$16 sps:$4 sm:$0xff]   ;;  %v1094_v6 = vld [vmem:[%s1516_s0 + $0x2c] ss:$16 sps:$4 sm:$0xff]  }
   0x3   :  { %146 = vmatprep.subr.bf16.mxu1 %v1088_v2  ;;  %106 = vmatpush1.bf16.msra.mxu0 %v1090_v3  ;;  %v1096_v7 = vld [vmem:[%s1516_s0 + $0x20] ss:$16 sps:$4 sm:$0xff]   ;;  %v1097_v8 = vld [vmem:[%s1516_s0 + $0x28] ss:$16 sps:$4 sm:$0xff]   ;;  %vm237_vm2 = vcmask 64512   ;;  %vm399_vm3 = vcmask 15360  }
   0x4   :  { %147 = vmatpush1.bf16.msra.mxu1 %v1091_v4  ;;  %107 = vmatprep.subr.bf16.mxu0 %v1092_v5  ;;  %v30_v9 = vld [vmem:[%s1516_s0 + $0x40] sm:$0x33]  ;;  %v31_v10 = vld [vmem:[%s1516_s0 + $0x48] sm:$0x33]  ;;  %v205_v25 = vld [vmem:[%s1518_s3 + $0x90] sm:$0xff] }
   0x5   :  { %148 = vmatprep.subr.bf16.mxu1 %v1094_v6  ;;  %v878_v11 = vcombine.high %v30_v9, %v30_v9  ;;  %v880_v12 = vcombine.high %v31_v10, %v31_v10  ;;  %v877_v13 = vcombine.low %v30_v9, %v30_v9  ;;  %v879_v14 = vcombine.low %v31_v10, %v31_v10  ;;  %v32_v15 = vld [vmem:[%s1517_s2] sm:$0xff]  ;;  %v204_v17 = vld [vmem:[%s1518_s3 + $0x88] sm:$0xff]  ;;  %v206_v26 = vld [vmem:[%s1518_s3 + $0x98] sm:$0xff] }
   0x6   :  { %35 = vperm.xlu0 %1085, %v32_v15   ;;  %v203_v16 = vld [vmem:[%s1518_s3 + $0x80] sm:$0xff]  ;;  %v220_v21 = vld [vmem:[%s1518_s3 + $0x108] sm:$0xff]  ;;  %v221_v30 = vld [vmem:[%s1518_s3 + $0x110] sm:$0xff]  ;;  %v1223_v33 = vpack.c.bf16 %v206_v26, %v205_v25 }
   0x7   :  { %108 = vmatpush1.bf16.msra.mxu0 %v1096_v7  ;;  %v219_v18 = vld [vmem:[%s1518_s3 + $0x100] sm:$0xff]  ;;  %v94_v19 = vsel %vm92_vm0, %v877_v13, 0  ;;  %v100_v20 = vsel %vm92_vm0, %v879_v14, 0  ;;  %v1194_v22 = vpack.c.bf16 %v204_v17, %v203_v16  ;;  %v188_v24 = vld [vmem:[%s1518_s3 + $0x8] sm:$0xff]  ;;  %v222_v32 = vld [vmem:[%s1518_s3 + $0x118] sm:$0xff] }
   0x8   :  { %149 = vmatpush1.bf16.msra.mxu1 %v1097_v8  ;;  %881 = vmatprep.subr.msk.bf16.mxu0 %vm92_vm0, %v878_v11  ;;  %v187_v23 = vld [vmem:[%s1518_s3] sm:$0xff]  ;;  %v1211_v28 = vpack.c.bf16 %v220_v21, %v219_v18  ;;  %v189_v34 = vld [vmem:[%s1518_s3 + $0x10] sm:$0xff]  ;;  %v190_v35 = vld [vmem:[%s1518_s3 + $0x18] sm:$0xff]  ;;  %v1239_v38 = vpack.c.bf16 %v222_v32, %v221_v30  ;;  %v1113_v32 = vmov 0.0  }
   0x9   :  { %883 = vmatprep.subr.msk.bf16.mxu1 %vm92_vm0, %v880_v12  ;;  %v21_v27 = vld [vmem:[%s1519_s1] sm:$0xf]  ;;  %v1213_v29 = vpack.c.bf16 %v188_v24, %v187_v23  ;;  %v208_v37 = vld [vmem:[%s1518_s3 + $0xa8] sm:$0xff]  ;;  %v1241_v39 = vpack.c.bf16 %v190_v35, %v189_v34  ;;  %v209_v45 = vld [vmem:[%s1518_s3 + $0xb0] sm:$0xff] }
   0xa   :  { %v207_v36 = vld [vmem:[%s1518_s3 + $0xa0] sm:$0xff]  ;;  %v224_v41 = vld [vmem:[%s1518_s3 + $0x128] sm:$0xff]  ;;  %v210_v46 = vld [vmem:[%s1518_s3 + $0xb8] sm:$0xff] }
   0xb   :  { %110 = vmatpush1.bf16.msra.mxu0 %v94_v19  ;;  %v223_v40 = vld [vmem:[%s1518_s3 + $0x120] sm:$0xff]  ;;  %v1251_v42 = vpack.c.bf16 %v208_v37, %v207_v36  ;;  %v192_v44 = vld [vmem:[%s1518_s3 + $0x28] sm:$0xff]  ;;  %v225_v49 = vld [vmem:[%s1518_s3 + $0x130] sm:$0xff]  ;;  %v1279_v51 = vpack.c.bf16 %v210_v46, %v209_v45 }
   0xc   :  { %151 = vmatpush1.bf16.msra.mxu1 %v100_v20  ;;  %970 = vmatprep.subr.bf16.mxu0 %v1194_v22  ;;  %v191_v43 = vld [vmem:[%s1518_s3 + $0x20] sm:$0xff]  ;;  %v1267_v47 = vpack.c.bf16 %v224_v41, %v223_v40  ;;  %v226_v50 = vld [vmem:[%s1518_s3 + $0x138] sm:$0xff]  ;;  %v193_v52 = vld [vmem:[%s1518_s3 + $0x30] sm:$0xff] }
   0xd   :  { %1001 = vmatprep.subr.bf16.mxu1 %v1112_v31  ;;  %v1269_v48 = vpack.c.bf16 %v192_v44, %v191_v43  ;;  %v194_v53 = vld [vmem:[%s1518_s3 + $0x38] sm:$0xff]  ;;  %v211_v54 = vld [vmem:[%s1518_s3 + $0xc0] sm:$0xff]  ;;  %v212_v55 = vld [vmem:[%s1518_s3 + $0xc8] sm:$0xff]  ;;  %v1295_v56 = vpack.c.bf16 %v226_v50, %v225_v49 }
   0xe   :  { %882 = vmatmul.mubr.msk.bf16.vlgmr.msra.gmra.mrb[0].mxu0 %vm88_vm1, %v21_v27  ;;  %v1297_v57 = vpack.c.bf16 %v194_v53, %v193_v52  ;;  %v227_v58 = vld [vmem:[%s1518_s3 + $0x140] sm:$0xff]  ;;  %v228_v59 = vld [vmem:[%s1518_s3 + $0x148] sm:$0xff]  ;;  %v1307_v60 = vpack.c.bf16 %v212_v55, %v211_v54  ;;  %v213_v63 = vld [vmem:[%s1518_s3 + $0xd0] sm:$0xff]  ;;  %v1114_v54 = vmov 1983009808  }
   0xf   :  { %884 = vmatmul.mubr.msk.bf16.vlgmr.msra.gmra.mrb[0].mxu1 %vm88_vm1, %v21_v27  ;;  %972 = vmatpush3.bf16.msra.mxu0 %v1213_v29  ;;  %v195_v61 = vld [vmem:[%s1518_s3 + $0x40] sm:$0xff]  ;;  %v196_v62 = vld [vmem:[%s1518_s3 + $0x48] sm:$0xff]  ;;  %v214_v0 = vld [vmem:[%s1518_s3 + $0xd8] sm:$0xff]  ;;  %v1323_v1 = vpack.c.bf16 %v228_v59, %v227_v58  ;;  %v384_v55 = vunpack.c.l.s4 %v1114_v54  ;;  %v386_v58 = vlaneseq }
  0x10   :  { %1003 = vmatpush1.bf16.msra.mxu1 %v1211_v28  ;;  %974 = vmatprep.subr.bf16.mxu0 %v1223_v33  ;;  %v1325_v2 = vpack.c.bf16 %v196_v62, %v195_v61  ;;  %v229_v3 = vld [vmem:[%s1518_s3 + $0x150] sm:$0xff]  ;;  %v230_v4 = vld [vmem:[%s1518_s3 + $0x158] sm:$0xff]  ;;  %v1335_v5 = vpack.c.bf16 %v214_v0, %v213_v63  ;;  %v215_v8 = vld [vmem:[%s1518_s3 + $0xe0] sm:$0xff] }
  0x11   :  { %1004 = vmatprep.subr.bf16.mxu1 %v1112_v31  ;;  %v197_v6 = vld [vmem:[%s1518_s3 + $0x50] sm:$0xff]  ;;  %v198_v7 = vld [vmem:[%s1518_s3 + $0x58] sm:$0xff]  ;;  %v216_v9 = vld [vmem:[%s1518_s3 + $0xe8] sm:$0xff]  ;;  %v1351_v10 = vpack.c.bf16 %v230_v4, %v229_v3  ;;  %v385_v59 = vunpack.c.0.s8 %v384_v55  ;;  %v387_v61 = vshrl.u32 %v386_v58, 7 }
  0x12   :  { %v1353_v11 = vpack.c.bf16 %v198_v7, %v197_v6  ;;  %v231_v12 = vld [vmem:[%s1518_s3 + $0x160] sm:$0xff]  ;;  %v232_v13 = vld [vmem:[%s1518_s3 + $0x168] sm:$0xff]  ;;  %v1363_v14 = vpack.c.bf16 %v216_v9, %v215_v8  ;;  %v233_v19 = vld [vmem:[%s1518_s3 + $0x170] sm:$0xff] }
  0x13   :  { %976 = vmatpush3.bf16.msra.mxu0 %v1241_v39  ;;  %v199_v15 = vld [vmem:[%s1518_s3 + $0x60] sm:$0xff]  ;;  %v200_v16 = vld [vmem:[%s1518_s3 + $0x68] sm:$0xff]  ;;  %v1373_v17 = vpack.c.bf16 %v232_v13, %v231_v12  ;;  %v234_v20 = vld [vmem:[%s1518_s3 + $0x178] sm:$0xff]  ;;  %v388_v63 = vsub.s32 %v385_v59, %v387_v61 }
  0x14   :  { %1006 = vmatpush1.bf16.msra.mxu1 %v1239_v38  ;;  %978 = vmatprep.subr.bf16.mxu0 %v1251_v42  ;;  %v1375_v18 = vpack.c.bf16 %v200_v16, %v199_v15  ;;  %v1388_v21 = vpack.c.bf16 %v234_v20, %v233_v19  ;;  %v217_v23 = vld [vmem:[%s1518_s3 + $0xf0] sm:$0xff]  ;;  %v218_v24 = vld [vmem:[%s1518_s3 + $0xf8] sm:$0xff]  ;;  %v1413_v34 = vld [vmem:[%s1518_s3 + $0x180] sm:$0xff] }
  0x15   :  { %1007 = vmatprep.subr.bf16.mxu1 %v1112_v31  ;;  %v1396_v25 = vpack.c.bf16 %v218_v24, %v217_v23  ;;  %v201_v26 = vld [vmem:[%s1518_s3 + $0x70] sm:$0xff]  ;;  %v202_v27 = vld [vmem:[%s1518_s3 + $0x78] sm:$0xff]  ;;  %v236_v62 = vld [vmem:[%s1520_s4] sm:$0xff] }
  0x16   :  { %v1405_v30 = vpack.c.bf16 %v202_v27, %v201_v26  ;;  %v382_v0 = vcombine.high %v236_v62, %v236_v62  ;;  %v1434_v3 = vrot.slane %v236_v62, %v388_v63 }
  0x17   :  { %980 = vmatpush3.bf16.msra.mxu0 %v1269_v48 }
  0x18   :  { %1009 = vmatpush1.bf16.msra.mxu1 %v1267_v47  ;;  %982 = vmatprep.subr.bf16.mxu0 %v1279_v51  ;;  %v1436_v4 = vrot.slane %v382_v0, %v388_v63  ;;  %v397_v6 = vcombine.high %v1434_v3, %v1434_v3 }
  0x19   :  { %1010 = vmatprep.subr.bf16.mxu1 %v1112_v31 }
  0x1a   :  { %v1442_v7 = vcombine.high %v1436_v4, %v1436_v4 }
  0x1b   :  { %984 = vmatpush3.bf16.msra.mxu0 %v1297_v57 }
  0x1c   :  { %1012 = vmatpush1.bf16.msra.mxu1 %v1295_v56  ;;  %986 = vmatprep.subr.bf16.mxu0 %v1307_v60 }
  0x1d   :  { %1013 = vmatprep.subr.bf16.mxu1 %v1112_v31 }
  0x1f   :  { %988 = vmatpush3.bf16.msra.mxu0 %v1325_v2 }
  0x20   :  { %1015 = vmatpush1.bf16.msra.mxu1 %v1323_v1  ;;  %990 = vmatprep.subr.bf16.mxu0 %v1335_v5 }
  0x21   :  { %1016 = vmatprep.subr.bf16.mxu1 %v1112_v31 }
  0x23   :  { %992 = vmatpush3.bf16.msra.mxu0 %v1353_v11 }
  0x24   :  { %1018 = vmatpush1.bf16.msra.mxu1 %v1351_v10  ;;  %994 = vmatprep.subr.bf16.mxu0 %v1363_v14 }
  0x25   :  { %1019 = vmatprep.subr.bf16.mxu1 %v1112_v31 }
  0x27   :  { %996 = vmatpush3.bf16.msra.mxu0 %v1375_v18 }
  0x28   :  { %1021 = vmatpush1.bf16.msra.mxu1 %v1373_v17  ;;  %998 = vmatprep.subr.bf16.mxu0 %v1396_v25 }
  0x29   :  { %1022 = vmatprep.subr.bf16.mxu1 %v1112_v31 }
  0x2b   :  { %1000 = vmatpush3.bf16.msra.mxu0 %v1405_v30 }
  0x2c   :  { %1024 = vmatpush1.bf16.msra.mxu1 %v1388_v21  ;;  %886 = vmatprep.subr.msk.mxu0 %vm92_vm0, %v397_v6 }
  0x2d   :  { %343 = vmatprep.subr.mxu1 %v1113_v32 }
  0x30   :  { %344 = vmatpush1.msra.mxu1 %v1413_v34 }
  0x31   :  { %889 = vmatprep.subr.msk.mxu1 %vm92_vm0, %v1442_v7 }
  0x85   :  { %v36_v35 = vpop.permute.xlu0 %35 }
  0xe1   :  { %v139_v36 = vpop.f32.mrb[0].mxu0 }
  0xe2   :  { %v180_v37 = vpop.f32.mrb[0].mxu1  ;;  %v141_v41 = vpop.f32.mrb[1].mxu0  ;;  %v1422_v50 = vadd.f32 %v139_v36, %v36_v35 }
  0xe3   :  { %v1416_v40 = vadd.f32 %v180_v37, %v36_v35  ;;  %v182_v43 = vpop.f32.mrb[1].mxu1  ;;  %v1418_v44 = vadd.f32 %v141_v41, %v36_v35  ;;  %v143_v46 = vpop.f32.mrb[2].mxu0 }
  0xe4   :  { %v1420_v45 = vadd.f32 %v182_v43, %v36_v35  ;;  %v184_v49 = vpop.f32.mrb[2].mxu1  ;;  %v144_v52 = vpop.f32.mrb[3].mxu0 }
  0xe5   :  { %v185_v53 = vpop.f32.mrb[3].mxu1  ;;  %305 = vmatprep.mubr.f32.mxu0 %v1418_v44 }
  0xe6   :  { %885 = vmatprep.mubr.msk.f32.mxu1 %vm237_vm2, %v1420_v45  ;;  %306 = vmatmul.mubr.f32.vlgmr.msra.gmra.mrb[4].mxu0 %v1422_v50 }
  0xe7   :  { %376 = vmatmul.mubr.f32.vlgmr.msra.gmra.mrb[4].mxu1 %v1416_v40  ;;  %475 = vmatprep.mubr.f32.mxu0 %v1113_v32 }
  0xe8   :  { %546 = vmatprep.mubr.f32.mxu1 %v1113_v32  ;;  %887 = vmatpush1.msk.msra.mxu0 %vm92_vm0, %v1434_v3 }
  0xe9   :  { %890 = vmatpush1.msk.msra.mxu1 %vm92_vm0, %v1436_v4  ;;  %1026 = vmatprep.subr.bf16.mxu0 %v1194_v22 }
  0xea   :  { %1057 = vmatprep.subr.bf16.mxu1 %v1112_v31 }
 0x1b9   :  { %v931_v8 = vpop.f32.mrb[4].mxu0 }
 0x1ba   :  { %v377_v9 = vpop.f32.mrb[4].mxu1  ;;  %v932_v12 = vpop.f32.mrb[5].mxu0 }
 0x1bb   :  { %v379_v13 = vpop.f32.mrb[5].mxu1  ;;  %v933_v15 = vadd.f32 %v932_v12, %v931_v8 }
 0x1bd   :  { %v378_v16 = vadd.f32 %v933_v15, %v377_v9 }
 0x1bf   :  { %888 = vmatmul.mubr.msk.f32.vlgmr.msra.gmra.mrb[6].mxu0 %vm399_vm3, %v378_v16  ;;  %891 = vmatmul.mubr.msk.f32.vlgmr.msra.gmra.mrb[6].mxu1 %vm399_vm3, %v378_v16 }
 0x1c0   :  { %1059 = vmatpush1.bf16.msra.mxu1 %v1211_v28  ;;  %1028 = vmatpush3.bf16.msra.mxu0 %v1213_v29 }
 0x1c1   :  { %1060 = vmatprep.subr.bf16.mxu1 %v1112_v31  ;;  %1030 = vmatprep.subr.bf16.mxu0 %v1223_v33 }
 0x1c4   :  { %1062 = vmatpush1.bf16.msra.mxu1 %v1239_v38  ;;  %1032 = vmatpush3.bf16.msra.mxu0 %v1241_v39 }
 0x1c5   :  { %1063 = vmatprep.subr.bf16.mxu1 %v1112_v31  ;;  %1034 = vmatprep.subr.bf16.mxu0 %v1251_v42 }
 0x1c8   :  { %1065 = vmatpush1.bf16.msra.mxu1 %v1267_v47  ;;  %1036 = vmatpush3.bf16.msra.mxu0 %v1269_v48 }
 0x1c9   :  { %1066 = vmatprep.subr.bf16.mxu1 %v1112_v31  ;;  %1038 = vmatprep.subr.bf16.mxu0 %v1279_v51 }
 0x1cc   :  { %1068 = vmatpush1.bf16.msra.mxu1 %v1295_v56  ;;  %1040 = vmatpush3.bf16.msra.mxu0 %v1297_v57 }
 0x1cd   :  { %1069 = vmatprep.subr.bf16.mxu1 %v1112_v31  ;;  %1042 = vmatprep.subr.bf16.mxu0 %v1307_v60 }
 0x1d0   :  { %1071 = vmatpush1.bf16.msra.mxu1 %v1323_v1  ;;  %1044 = vmatpush3.bf16.msra.mxu0 %v1325_v2 }
 0x1d1   :  { %1072 = vmatprep.subr.bf16.mxu1 %v1112_v31  ;;  %1046 = vmatprep.subr.bf16.mxu0 %v1335_v5 }
 0x1d4   :  { %1074 = vmatpush1.bf16.msra.mxu1 %v1351_v10  ;;  %1048 = vmatpush3.bf16.msra.mxu0 %v1353_v11 }
 0x1d5   :  { %1075 = vmatprep.subr.bf16.mxu1 %v1112_v31  ;;  %1050 = vmatprep.subr.bf16.mxu0 %v1363_v14 }
 0x1d8   :  { %1077 = vmatpush1.bf16.msra.mxu1 %v1373_v17  ;;  %1052 = vmatpush3.bf16.msra.mxu0 %v1375_v18 }
 0x1d9   :  { %1078 = vmatprep.subr.bf16.mxu1 %v1112_v31  ;;  %1054 = vmatprep.subr.bf16.mxu0 %v1396_v25 }
 0x1dc   :  { %1080 = vmatpush1.bf16.msra.mxu1 %v1388_v21  ;;  %1056 = vmatpush3.bf16.msra.mxu0 %v1405_v30 }
 0x1dd   :  { %666 = vmatprep.subr.mxu1 %v1113_v32  ;;  %893 = vmatprep.subr.msk.mxu0 %vm92_vm0, %v397_v6 }
 0x1e0   :  { %667 = vmatpush1.msra.mxu1 %v1413_v34 }
 0x292   :  { %v477_v22 = vpop.f32.mrb[6].mxu0  ;;  %v548_v28 = vpop.f32.mrb[6].mxu1 }
 0x293   :  { %v553_v29 = vsub.f32 %v1422_v50, %v477_v22  ;;  %v555_v33 = vsub.f32 %v1416_v40, %v548_v28  ;;  %v479_v38 = vpop.f32.mrb[7].mxu0  ;;  %v550_v31 = vpop.f32.mrb[7].mxu1 }
 0x294   :  { %v554_v39 = vsub.f32 %v1418_v44, %v479_v38  ;;  %v556_v42 = vsub.f32 %v1420_v45, %v550_v31 }
 0x295   :  { %v557_v51 = vmul.f32 %v553_v29, %v553_v29  ;;  %v559_v56 = vmul.f32 %v555_v33, %v555_v33 }
 0x296   :  { %v558_v47 = vmul.f32 %v554_v39, %v554_v39  ;;  %v560_v48 = vmul.f32 %v556_v42, %v556_v42 }
 0x298   :  { %628 = vmatprep.mubr.f32.mxu0 %v558_v47  ;;  %892 = vmatprep.mubr.msk.f32.mxu1 %vm237_vm2, %v560_v48 }
 0x299   :  { %629 = vmatmul.mubr.f32.vlgmr.msra.gmra.mrb[8].mxu0 %v557_v51  ;;  %699 = vmatmul.mubr.f32.vlgmr.msra.gmra.mrb[8].mxu1 %v559_v56 }
 0x29a   :  { %894 = vmatpush1.msk.msra.mxu0 %vm92_vm0, %v1434_v3  ;;  %771 = vmatprep.mubr.f32.mxu0 %v1113_v32 }
 0x29b   :  { %896 = vmatprep.subr.msk.mxu0 %vm92_vm0, %v1442_v7 }
 0x36c   :  { %v966_v57 = vpop.f32.mrb[8].mxu0  ;;  %v700_v60 = vpop.f32.mrb[8].mxu1 }
 0x36d   :  { %v967_v1 = vpop.f32.mrb[9].mxu0  ;;  %v702_v2 = vpop.f32.mrb[9].mxu1 }
 0x36e   :  { %v968_v5 = vadd.f32 %v967_v1, %v966_v57 }
 0x370   :  { %v701_v10 = vadd.f32 %v968_v5, %v700_v60 }
 0x372   :  { %895 = vmatmul.mubr.msk.f32.vlgmr.msra.gmra.mrb[10].mxu0 %vm399_vm3, %v701_v10 }
 0x373   :  { %897 = vmatpush1.msk.msra.mxu0 %vm92_vm0, %v1436_v4  ;;  %842 = vmatprep.mubr.f32.mxu0 %v1113_v32 }
 0x376   :  { %898 = vmatmul.mubr.msk.f32.vlgmr.msra.gmra.mrb[12].mxu0 %vm399_vm3, %v701_v10 }
 0x445   :  { %v773_v11 = vpop.f32.mrb[10].mxu0 }
 0x446   :  { %v774_v14 = vadd.f32 1e-05, %v773_v11  ;;  %v775_v17 = vpop.f32.mrb[11].mxu0 }
 0x447   :  { %v776_v18 = vadd.f32 1e-05, %v775_v17 }
 0x448   :  { %1103 = vrsqrt.f32 %v774_v14 }
 0x449   :  { %1105 = vrsqrt.f32 %v776_v18  ;;  %v844_v19 = vpop.f32.mrb[12].mxu0 }
 0x44a   :  { %v845_v20 = vadd.f32 1e-05, %v844_v19  ;;  %v846_v21 = vpop.f32.mrb[13].mxu0 }
 0x44b   :  { %v847_v23 = vadd.f32 1e-05, %v846_v21 }
 0x44c   :  { %1107 = vrsqrt.f32 %v845_v20 }
 0x44d   :  { %1109 = vrsqrt.f32 %v847_v23 }
 0x452   :  { %v1104_v24 = vpop.eup %1103 }
 0x453   :  { %v1106_v25 = vpop.eup %1105  ;;  %v853_v26 = vmul.f32 %v1104_v24, %v553_v29 }
 0x454   :  { %v854_v27 = vmul.f32 %v1106_v25, %v554_v39 }
 0x455   :  { %v857_v30 = vmax.f32 %v853_v26, 0.0 }
 0x456   :  { %v1108_v32 = vpop.eup %1107  ;;  %v858_v34 = vmax.f32 %v854_v27, 0.0 }
 0x457   :  { %v1110_v35 = vpop.eup %1109  ;;  %861 = vst [vmem:[%s1521_s5] sm:$0xff] %v857_v30  ;;  %v855_v36 = vmul.f32 %v1108_v32, %v555_v33 }
 0x458   :  { %862 = vst [vmem:[%s1521_s5 + $0x8] sm:$0xff] %v858_v34  ;;  %v856_v37 = vmul.f32 %v1110_v35, %v556_v42 }
 0x459   :  { %v859_v40 = vmax.f32 %v855_v36, 0.0 }
 0x45a   :  { %v860_v41 = vmax.f32 %v856_v37, 0.0 }
 0x45b   :  { %863 = vst [vmem:[%s1521_s5 + $0x10] sm:$0xff] %v859_v40 }
 0x45c   :  { %864 = vst.msk [vmem:[%s1521_s5 + $0x18] sm:$0xff] %vm237_vm2, %v860_v41 }

// kernel: generator_forward.15
= control target key start
LH: loop header
LB: loop body
LE: loop exit
PB: predicated region body
PF: predicated region fallthrough
CT: control target
= control target key end

     0   :  { %v643_v0 = vmov 0.0   ;;  %vm644_vm0 = vmmov 0   ;;  %v645_v2 = vmov 0   ;;  %vm80_vm1 = vcmask 1043456   ;;  %s751_s0 = inlined_call_operand.vmem [shape: bf16[72,72], index: 0, kind: input, shape index: {}]   ;;  %s752_s2 = inlined_call_operand.vmem [shape: f32[16,1], index: 2, kind: input, shape index: {}]   ;;  %s753_s1 = inlined_call_operand.vmem [shape: bf16[16,72], index: 1, kind: input, shape index: {}]   ;;  %s754_s3 = inlined_call_operand.vmem [shape: f32[72,2], index: 3, kind: input, shape index: {}]   ;;  %s755_s4 = inlined_call_operand.vmem [shape: f32[2,72], index: 4, kind: input, shape index: {}]   ;;  %s756_s5 = inlined_call_operand.vmem [shape: f32[16,72], index: 5, kind: output, shape index: {}]  }
   0x1   :  { %531 = vmatprep.subr.bf16.mxu0 %v643_v0  ;;  %v633_v1 = vld [vmem:[%s751_s0] sm:$0xff]   ;;  %541 = vmatprep.mubr.msk.bf16.mxu0 %vm644_vm0, %v643_v0  ;;  %v634_v3 = vld [vmem:[%s751_s0 + $0x8] sm:$0xff]   ;;  %v635_v5 = vld [vmem:[%s751_s0 + $0x10] sm:$0xff]   ;;  %vm76_vm2 = vcmask 588800   ;;  %vm223_vm3 = vcmask 1041408   ;;  %vm216_vm4 = vcmask 15360  }
   0x2   :  { %632 = vset.pattern.permute.xlu0 %v645_v2  ;;  %532 = vmatpush3.bf16.msra.mxu0 %v633_v1  ;;  %v32_v4 = vld [vmem:[%s752_s2] sm:$0xff]  ;;  %v126_v7 = vld [vmem:[%s754_s3 + $0x8] sm:$0xff]  ;;  %v127_v10 = vld [vmem:[%s754_s3 + $0x10] sm:$0xff] }
   0x3   :  { %533 = vmatprep.subr.bf16.mxu0 %v643_v0  ;;  %36 = vperm.xlu0 %632, %v32_v4   ;;  %v125_v6 = vld [vmem:[%s754_s3] sm:$0xff]  ;;  %v33_v8 = vld [vmem:[%s752_s2 + $0x8] sm:$0xff]  ;;  %v128_v11 = vld [vmem:[%s754_s3 + $0x18] sm:$0xff] }
   0x4   :  { %v597_v9 = vpack.c.bf16 %v126_v7, %v125_v6  ;;  %v601_v12 = vpack.c.bf16 %v128_v11, %v127_v10  ;;  %v129_v13 = vld [vmem:[%s754_s3 + $0x20] sm:$0xff]  ;;  %v130_v14 = vld [vmem:[%s754_s3 + $0x28] sm:$0xff]  ;;  %v636_v15 = vld [vmem:[%s751_s0 + $0x18] sm:$0xff]  }
   0x5   :  { %v637_v16 = vld [vmem:[%s751_s0 + $0x20] ss:$0 sps:$4 sm:$0xff]   ;;  %v605_v17 = vpack.c.bf16 %v130_v14, %v129_v13  ;;  %v131_v18 = vld [vmem:[%s754_s3 + $0x30] sm:$0xff]  ;;  %v132_v19 = vld [vmem:[%s754_s3 + $0x38] sm:$0xff] }
   0x6   :  { %534 = vmatpush3.bf16.msra.mxu0 %v634_v3  ;;  %598 = vmatprep.subr.bf16.mxu1 %v597_v9  ;;  %v82_v20 = vsel %vm80_vm1, %v637_v16, 0  ;;  %v609_v21 = vpack.c.bf16 %v132_v19, %v131_v18  ;;  %v638_v22 = vld [vmem:[%s753_s1] sm:$0xff]  }
   0x7   :  { %535 = vmatprep.subr.bf16.mxu0 %v643_v0  ;;  %41 = vperm.xlu0 %632, %v33_v8   ;;  %v133_v23 = vld [vmem:[%s754_s3 + $0x40] sm:$0xff] }
   0x8   :  { %600 = vmatpush3.bf16.msra.mxu1 %v597_v9  ;;  %v134_v24 = vld [vmem:[%s755_s4] sm:$0x3] }
   0x9   :  { %602 = vmatprep.subr.bf16.mxu1 %v601_v12 }
   0xa   :  { %536 = vmatpush3.bf16.msra.mxu0 %v635_v5 }
   0xb   :  { %537 = vmatprep.subr.bf16.mxu0 %v643_v0 }
   0xc   :  { %604 = vmatpush3.bf16.msra.mxu1 %v601_v12 }
   0xd   :  { %606 = vmatprep.subr.bf16.mxu1 %v605_v17 }
   0xe   :  { %538 = vmatpush3.bf16.msra.mxu0 %v636_v15 }
   0xf   :  { %539 = vmatprep.subr.bf16.mxu0 %v643_v0 }
  0x10   :  { %608 = vmatpush3.bf16.msra.mxu1 %v605_v17 }
  0x11   :  { %610 = vmatprep.subr.bf16.mxu1 %v609_v21 }
  0x12   :  { %540 = vmatpush3.bf16.msra.mxu0 %v82_v20 }
  0x13   :  { %614 = vmatprep.subr.bf16.mxu0 %v597_v9 }
  0x14   :  { %612 = vmatpush3.bf16.msra.mxu1 %v609_v21 }
  0x15   :  { %542 = vmatmul.mubr.msk.bf16.vlgmr.msra.gmra.mrb[0].mxu0 %vm76_vm2, %v638_v22  ;;  %561 = vmatprep.subr.mxu1 %v133_v23 }
  0x16   :  { %616 = vmatpush3.bf16.msra.mxu0 %v597_v9 }
  0x17   :  { %618 = vmatprep.subr.bf16.mxu0 %v601_v12 }
  0x18   :  { %562 = vmatpush3.msra.mxu1 %v133_v23 }
  0x19   :  { %566 = vmatprep.subr.msk.mxu1 %vm223_vm3, %v134_v24 }
  0x1a   :  { %620 = vmatpush3.bf16.msra.mxu0 %v601_v12 }
  0x1b   :  { %622 = vmatprep.subr.bf16.mxu0 %v605_v17 }
  0x1e   :  { %624 = vmatpush3.bf16.msra.mxu0 %v605_v17 }
  0x1f   :  { %626 = vmatprep.subr.bf16.mxu0 %v609_v21 }
  0x22   :  { %628 = vmatpush3.bf16.msra.mxu0 %v609_v21 }
  0x23   :  { %587 = vmatprep.subr.mxu0 %v133_v23 }
  0x26   :  { %588 = vmatpush3.msra.mxu0 %v133_v23 }
  0x82   :  { %v37_v25 = vpop.permute.xlu0 %36 }
  0x86   :  { %v42_v29 = vpop.permute.xlu0 %41 }
  0xe8   :  { %v118_v26 = vpop.f32.mrb[0].mxu0 }
  0xe9   :  { %v119_v27 = vadd.f32 %v118_v26, %v37_v25  ;;  %v543_v28 = vpop.f32.mrb[1].mxu0 }
  0xea   :  { %v121_v30 = vpop.f32.mrb[2].mxu0 }
  0xeb   :  { %v122_v31 = vadd.f32 %v121_v30, %v42_v29  ;;  %v544_v32 = vpop.f32.mrb[3].mxu0  ;;  %563 = vmatprep.mubr.msk.f32.mxu1 %vm76_vm2, %v119_v27 }
  0xed   :  { %564 = vmatmul.mubr.msk.f32.vlgmr.msra.gmra.mrb[0].mxu1 %vm76_vm2, %v122_v31 }
  0xee   :  { %567 = vmatpush3.msk.msra.mxu1 %vm223_vm3, %v134_v24 }
  0xef   :  { %592 = vmatprep.subr.msk.mxu1 %vm223_vm3, %v134_v24 }
 0x1c0   :  { %v565_v33 = vpop.f32.mrb[0].mxu1 }
 0x1c1   :  { %v207_v34 = vpop.f32.mrb[1].mxu1 }
 0x1c2   :  { %568 = vmatprep.mubr.msk.f32.mxu1 %vm216_vm4, %v207_v34 }
 0x1c3   :  { %569 = vmatmul.mubr.msk.f32.vlgmr.msra.gmra.mrb[2].mxu1 %vm216_vm4, %v565_v33 }
 0x1c4   :  { %593 = vmatpush3.msk.msra.mxu1 %vm223_vm3, %v134_v24 }
 0x296   :  { %v570_v35 = vpop.f32.mrb[2].mxu1 }
 0x297   :  { %v303_v36 = vsub.f32 %v122_v31, %v570_v35  ;;  %v293_v37 = vpop.f32.mrb[3].mxu1 }
 0x298   :  { %v302_v38 = vsub.f32 %v119_v27, %v293_v37 }
 0x299   :  { %v305_v40 = vmul.f32 %v303_v36, %v303_v36 }
 0x29a   :  { %v304_v39 = vmul.f32 %v302_v38, %v302_v38 }
 0x29c   :  { %589 = vmatprep.mubr.msk.f32.mxu0 %vm76_vm2, %v304_v39 }
 0x29d   :  { %590 = vmatmul.mubr.msk.f32.vlgmr.msra.gmra.mrb[4].mxu0 %vm76_vm2, %v305_v40 }
 0x370   :  { %v591_v41 = vpop.f32.mrb[4].mxu0 }
 0x371   :  { %v378_v42 = vpop.f32.mrb[5].mxu0 }
 0x372   :  { %594 = vmatprep.mubr.msk.f32.mxu1 %vm216_vm4, %v378_v42 }
 0x373   :  { %595 = vmatmul.mubr.msk.f32.vlgmr.msra.gmra.mrb[4].mxu1 %vm216_vm4, %v591_v41 }
 0x446   :  { %v596_v43 = vpop.f32.mrb[4].mxu1 }
 0x447   :  { %v465_v44 = vadd.f32 1e-05, %v596_v43  ;;  %v459_v45 = vpop.f32.mrb[5].mxu1 }
 0x448   :  { %v460_v46 = vadd.f32 1e-05, %v459_v45 }
 0x449   :  { %639 = vrsqrt.f32 %v465_v44 }
 0x44a   :  { %641 = vrsqrt.f32 %v460_v46 }
 0x453   :  { %v640_v47 = vpop.eup %639 }
 0x454   :  { %v642_v48 = vpop.eup %641  ;;  %v471_v49 = vmul.f32 %v640_v47, %v303_v36 }
 0x455   :  { %v470_v50 = vmul.f32 %v642_v48, %v302_v38 }
 0x456   :  { %v473_v51 = vmax.f32 %v471_v49, 0.0 }
 0x457   :  { %v472_v52 = vmax.f32 %v470_v50, 0.0 }
 0x458   :  { %475 = vst.msk [vmem:[%s756_s5 + $0x8] sm:$0xff] %vm76_vm2, %v473_v51 }
 0x459   :  { %474 = vst.msk [vmem:[%s756_s5] sm:$0xff] %vm76_vm2, %v472_v52 }

// kernel: generator_forward.16
= control target key start
LH: loop header
LB: loop body
LE: loop exit
PB: predicated region body
PF: predicated region fallthrough
CT: control target
= control target key end

     0   :  { %v730_v0 = vmov 0   ;;  %vm139_vm0 = vcmask 130048   ;;  %vm308_vm1 = vcmask 1041408   ;;  %vm197_vm2 = vcmask 64512   ;;  %s856_s0 = inlined_call_operand.vmem [shape: bf16[144,8], index: 0, kind: input, shape index: {}]   ;;  %s857_s1 = inlined_call_operand.vmem [shape: bf16[32,144], index: 1, kind: input, shape index: {}]   ;;  %s858_s2 = inlined_call_operand.vmem [shape: f32[32,1], index: 2, kind: input, shape index: {}]   ;;  %s859_s3 = inlined_call_operand.vmem [shape: f32[8,2], index: 3, kind: input, shape index: {}]   ;;  %s860_s4 = inlined_call_operand.vmem [shape: f32[2,8], index: 4, kind: input, shape index: {}]   ;;  %s861_s5 = inlined_call_operand.vmem [shape: f32[32,8], index: 5, kind: output, shape index: {}]  }
   0x1   :  { %146 = vmatprep.subr.bf16.mxu0 %v730_v0  ;;  %v707_v1 = vld [vmem:[%s856_s0] sm:$0xff]   ;;  %705 = vset.pattern.permute.xlu0 %v730_v0  ;;  %v708_v2 = vld [vmem:[%s856_s0 + $0x8] sm:$0xff]   ;;  %v709_v3 = vld [vmem:[%s856_s0 + $0x10] sm:$0xff]   ;;  %vm295_vm3 = vcmask 15360  }
   0x2   :  { %706 = vset.pattern.permute.xlu1 %v730_v0  ;;  %147 = vmatpush1.bf16.msra.mxu0 %v707_v1  ;;  %v710_v4 = vld [vmem:[%s856_s0 + $0x18] sm:$0xff]   ;;  %v718_v5 = vld [vmem:[%s857_s1 + $0x4] ss:$8 sps:$4 sm:$0xff]   ;;  %v45_v7 = vld [vmem:[%s858_s2 + $0x10] sm:$0xff] }
   0x3   :  { %148 = vmatprep.subr.bf16.mxu0 %v730_v0  ;;  %v43_v6 = vld [vmem:[%s858_s2] sm:$0xff]  ;;  %632 = vmatprep.mubr.msk.bf16.mxu0 %vm139_vm0, %v718_v5  ;;  %v44_v8 = vld [vmem:[%s858_s2 + $0x8] sm:$0xff]  ;;  %v46_v10 = vld [vmem:[%s858_s2 + $0x18] sm:$0xff] }
   0x4   :  { %49 = vperm.xlu0 %705, %v43_v6   ;;  %59 = vperm.xlu1 %706, %v45_v7   ;;  %v711_v9 = vld [vmem:[%s856_s0 + $0x20] sm:$0xff]   ;;  %v712_v11 = vld [vmem:[%s856_s0 + $0x28] sm:$0xff]   ;;  %v713_v12 = vld [vmem:[%s856_s0 + $0x30] sm:$0xff]  }
   0x5   :  { %v714_v13 = vld [vmem:[%s856_s0 + $0x38] sm:$0xff]   ;;  %v715_v14 = vld [vmem:[%s856_s0 + $0x40] sm:$0xff]  }
   0x6   :  { %149 = vmatpush1.bf16.msra.mxu0 %v708_v2  ;;  %v716_v15 = vld [vmem:[%s857_s1] ss:$8 sps:$4 sm:$0xff]   ;;  %v719_v16 = vld [vmem:[%s857_s1 + $0x14] ss:$8 sps:$4 sm:$0xff]   ;;  %v721_v17 = vld [vmem:[%s857_s1 + $0x10] ss:$8 sps:$4 sm:$0xff]  }
   0x7   :  { %150 = vmatprep.subr.bf16.mxu0 %v730_v0  ;;  %v195_v18 = vld [vmem:[%s859_s3] sm:$0xff] }
   0x8   :  { %54 = vperm.xlu0 %705, %v44_v8   ;;  %64 = vperm.xlu1 %706, %v46_v10   ;;  %v196_v19 = vld [vmem:[%s860_s4] sm:$0x3] }
   0x9   :  { %672 = vmatprep.subr.mxu1 %v195_v18 }
   0xa   :  { %151 = vmatpush1.bf16.msra.mxu0 %v709_v3  ;;  %673 = vmatpush3.msra.mxu1 %v195_v18 }
   0xb   :  { %152 = vmatprep.subr.bf16.mxu0 %v730_v0  ;;  %680 = vmatprep.subr.msk.mxu1 %vm308_vm1, %v196_v19 }
   0xe   :  { %153 = vmatpush1.bf16.msra.mxu0 %v710_v4 }
   0xf   :  { %154 = vmatprep.subr.bf16.mxu0 %v730_v0 }
  0x12   :  { %155 = vmatpush1.bf16.msra.mxu0 %v711_v9 }
  0x13   :  { %156 = vmatprep.subr.bf16.mxu0 %v730_v0 }
  0x16   :  { %157 = vmatpush1.bf16.msra.mxu0 %v712_v11 }
  0x17   :  { %158 = vmatprep.subr.bf16.mxu0 %v730_v0 }
  0x1a   :  { %159 = vmatpush1.bf16.msra.mxu0 %v713_v12 }
  0x1b   :  { %160 = vmatprep.subr.bf16.mxu0 %v730_v0 }
  0x1e   :  { %161 = vmatpush1.bf16.msra.mxu0 %v714_v13 }
  0x1f   :  { %162 = vmatprep.subr.bf16.mxu0 %v730_v0 }
  0x22   :  { %163 = vmatpush1.bf16.msra.mxu0 %v715_v14 }
  0x25   :  { %179 = vmatmul.mubr.bf16.vlgmr.msra.gmra.mrb[0].mxu0 %v716_v15 }
  0x26   :  { %633 = vmatprep.mubr.msk.bf16.mxu0 %vm139_vm0, %v719_v16 }
  0x2d   :  { %187 = vmatmul.mubr.bf16.gmra.mrb[4].mxu0 %v721_v17 }
  0x83   :  { %v50_v20 = vpop.permute.xlu0 %49  ;;  %v60_v28 = vpop.permute.xlu1 %59 }
  0x87   :  { %v55_v22 = vpop.permute.xlu0 %54  ;;  %v65_v32 = vpop.permute.xlu1 %64 }
  0xf8   :  { %v180_v21 = vpop.f32.mrb[0].mxu0 }
  0xf9   :  { %v181_v23 = vadd.f32 %v180_v21, %v50_v20  ;;  %v182_v24 = vpop.f32.mrb[1].mxu0 }
  0xfa   :  { %v183_v25 = vpop.f32.mrb[2].mxu0 }
  0xfb   :  { %v184_v26 = vadd.f32 %v183_v25, %v55_v22  ;;  %v185_v27 = vpop.f32.mrb[3].mxu0  ;;  %674 = vmatprep.mubr.msk.f32.mxu1 %vm197_vm2, %v181_v23 }
  0xfd   :  { %675 = vmatmul.mubr.msk.f32.vlgmr.msra.gmra.mrb[0].mxu1 %vm197_vm2, %v184_v26 }
  0xfe   :  { %681 = vmatpush3.msk.msra.mxu1 %vm308_vm1, %v196_v19 }
  0xff   :  { %688 = vmatprep.subr.mxu1 %v195_v18 }
 0x100   :  { %v188_v29 = vpop.f32.mrb[4].mxu0 }
 0x101   :  { %v189_v30 = vadd.f32 %v188_v29, %v60_v28  ;;  %v190_v31 = vpop.f32.mrb[5].mxu0 }
 0x102   :  { %v191_v33 = vpop.f32.mrb[6].mxu0 }
 0x103   :  { %v192_v34 = vadd.f32 %v191_v33, %v65_v32  ;;  %v193_v35 = vpop.f32.mrb[7].mxu0  ;;  %677 = vmatprep.mubr.msk.f32.mxu1 %vm197_vm2, %v189_v30 }
 0x105   :  { %678 = vmatmul.mubr.msk.f32.gmra.mrb[2].mxu1 %vm197_vm2, %v192_v34 }
 0x1d0   :  { %v676_v36 = vpop.f32.mrb[0].mxu1 }
 0x1d1   :  { %v276_v37 = vpop.f32.mrb[1].mxu1 }
 0x1d2   :  { %682 = vmatprep.mubr.msk.f32.mxu1 %vm295_vm3, %v276_v37 }
 0x1d3   :  { %683 = vmatmul.mubr.msk.f32.vlgmr.msra.gmra.mrb[4].mxu1 %vm295_vm3, %v676_v36 }
 0x1d4   :  { %689 = vmatpush3.msra.mxu1 %v195_v18 }
 0x1d5   :  { %696 = vmatprep.subr.msk.mxu1 %vm308_vm1, %v196_v19 }
 0x1d8   :  { %v679_v38 = vpop.f32.mrb[2].mxu1 }
 0x1d9   :  { %v286_v39 = vpop.f32.mrb[3].mxu1 }
 0x1da   :  { %685 = vmatprep.mubr.msk.f32.mxu1 %vm295_vm3, %v286_v39 }
 0x1db   :  { %686 = vmatmul.mubr.msk.f32.gmra.mrb[6].mxu1 %vm295_vm3, %v679_v38 }
 0x2a6   :  { %v684_v40 = vpop.f32.mrb[4].mxu1 }
 0x2a7   :  { %v398_v41 = vsub.f32 %v184_v26, %v684_v40  ;;  %v378_v42 = vpop.f32.mrb[5].mxu1 }
 0x2a8   :  { %v397_v43 = vsub.f32 %v181_v23, %v378_v42 }
 0x2a9   :  { %v402_v45 = vmul.f32 %v398_v41, %v398_v41 }
 0x2aa   :  { %v401_v44 = vmul.f32 %v397_v43, %v397_v43 }
 0x2ac   :  { %690 = vmatprep.mubr.msk.f32.mxu1 %vm197_vm2, %v401_v44 }
 0x2ad   :  { %691 = vmatmul.mubr.msk.f32.vlgmr.msra.gmra.mrb[8].mxu1 %vm197_vm2, %v402_v45 }
 0x2ae   :  { %v687_v46 = vpop.f32.mrb[6].mxu1  ;;  %697 = vmatpush3.msk.msra.mxu1 %vm308_vm1, %v196_v19 }
 0x2af   :  { %v400_v47 = vsub.f32 %v192_v34, %v687_v46  ;;  %v388_v48 = vpop.f32.mrb[7].mxu1 }
 0x2b0   :  { %v399_v49 = vsub.f32 %v189_v30, %v388_v48 }
 0x2b1   :  { %v404_v51 = vmul.f32 %v400_v47, %v400_v47 }
 0x2b2   :  { %v403_v50 = vmul.f32 %v399_v49, %v399_v49 }
 0x2b4   :  { %693 = vmatprep.mubr.msk.f32.mxu1 %vm197_vm2, %v403_v50 }
 0x2b5   :  { %694 = vmatmul.mubr.msk.f32.gmra.mrb[10].mxu1 %vm197_vm2, %v404_v51 }
 0x380   :  { %v692_v52 = vpop.f32.mrb[8].mxu1 }
 0x381   :  { %v483_v53 = vpop.f32.mrb[9].mxu1 }
 0x382   :  { %698 = vmatprep.mubr.msk.f32.mxu1 %vm295_vm3, %v483_v53 }
 0x383   :  { %699 = vmatmul.mubr.msk.f32.vlgmr.msra.gmra.mrb[12].mxu1 %vm295_vm3, %v692_v52 }
 0x388   :  { %v695_v54 = vpop.f32.mrb[10].mxu1 }
 0x389   :  { %v493_v55 = vpop.f32.mrb[11].mxu1 }
 0x38a   :  { %701 = vmatprep.mubr.msk.f32.mxu1 %vm295_vm3, %v493_v55 }
 0x38b   :  { %702 = vmatmul.mubr.msk.f32.gmra.mrb[14].mxu1 %vm295_vm3, %v695_v54 }
 0x456   :  { %v700_v56 = vpop.f32.mrb[12].mxu1 }
 0x457   :  { %v586_v57 = vadd.f32 1e-05, %v700_v56  ;;  %v580_v58 = vpop.f32.mrb[13].mxu1 }
 0x458   :  { %v581_v59 = vadd.f32 1e-05, %v580_v58 }
 0x459   :  { %722 = vrsqrt.f32 %v586_v57 }
 0x45a   :  { %724 = vrsqrt.f32 %v581_v59 }
 0x45e   :  { %v703_v60 = vpop.f32.mrb[14].mxu1 }
 0x45f   :  { %v596_v61 = vadd.f32 1e-05, %v703_v60  ;;  %v590_v62 = vpop.f32.mrb[15].mxu1 }
 0x460   :  { %v591_v63 = vadd.f32 1e-05, %v590_v62 }
 0x461   :  { %726 = vrsqrt.f32 %v596_v61 }
 0x462   :  { %728 = vrsqrt.f32 %v591_v63 }
 0x463   :  { %v723_v0 = vpop.eup %722 }
 0x464   :  { %v725_v1 = vpop.eup %724  ;;  %v604_v2 = vmul.f32 %v723_v0, %v398_v41 }
 0x465   :  { %v603_v3 = vmul.f32 %v725_v1, %v397_v43 }
 0x466   :  { %v608_v4 = vmax.f32 %v604_v2, 0.0 }
 0x467   :  { %v607_v5 = vmax.f32 %v603_v3, 0.0 }
 0x468   :  { %612 = vst.msk [vmem:[%s861_s5 + $0x8] sm:$0xff] %vm197_vm2, %v608_v4 }
 0x469   :  { %611 = vst.msk [vmem:[%s861_s5] sm:$0xff] %vm197_vm2, %v607_v5 }
 0x46b   :  { %v727_v6 = vpop.eup %726 }
 0x46c   :  { %v729_v7 = vpop.eup %728  ;;  %v606_v8 = vmul.f32 %v727_v6, %v400_v47 }
 0x46d   :  { %v605_v9 = vmul.f32 %v729_v7, %v399_v49 }
 0x46e   :  { %v610_v10 = vmax.f32 %v606_v8, 0.0 }
 0x46f   :  { %v609_v11 = vmax.f32 %v605_v9, 0.0 }
 0x470   :  { %614 = vst.msk [vmem:[%s861_s5 + $0x18] sm:$0xff] %vm197_vm2, %v610_v10 }
 0x471   :  { %613 = vst.msk [vmem:[%s861_s5 + $0x10] sm:$0xff] %vm197_vm2, %v609_v11 }

// kernel: generator_forward.17
= control target key start
LH: loop header
LB: loop body
LE: loop exit
PB: predicated region body
PF: predicated region fallthrough
CT: control target
= control target key end

     0   :  { %v495_v1 = vmov 0   ;;  %vm221_vm0 = vcmask 261120   ;;  %vm326_vm1 = vcmask 64512   ;;  %s626_s0 = inlined_call_operand.vmem [shape: bf16[288,8], index: 0, kind: input, shape index: {}]   ;;  %s627_s1 = inlined_call_operand.vmem [shape: bf16[32,288], index: 1, kind: input, shape index: {}]   ;;  %s628_s2 = inlined_call_operand.vmem [shape: f32[32,1], index: 2, kind: input, shape index: {}]   ;;  %s629_s3 = inlined_call_operand.vmem [shape: f32[32,8], index: 3, kind: output, shape index: {}]  }
   0x1   :  { %v461_v0 = vld [vmem:[%s626_s0 + $0x40] sm:$0xff]   ;;  %459 = vset.pattern.permute.xlu0 %v495_v1  ;;  %460 = vset.pattern.permute.xlu1 %v495_v1  ;;  %v463_v3 = vld [vmem:[%s626_s0 + $0x48] sm:$0xff]   ;;  %v465_v5 = vld [vmem:[%s626_s0 + $0x50] sm:$0xff]  }
   0x2   :  { %v462_v2 = vld [vmem:[%s626_s0] sm:$0xff]   ;;  %418 = vmatprep.subr.bf16.mxu0 %v461_v0  ;;  %v464_v4 = vld [vmem:[%s626_s0 + $0x8] sm:$0xff]   ;;  %v466_v6 = vld [vmem:[%s626_s0 + $0x10] sm:$0xff]  }
   0x3   :  { %419 = vmatpush3.bf16.msra.mxu0 %v462_v2  ;;  %v467_v7 = vld [vmem:[%s626_s0 + $0x58] sm:$0xff]   ;;  %v469_v9 = vld [vmem:[%s626_s0 + $0x60] sm:$0xff]   ;;  %v471_v12 = vld [vmem:[%s626_s0 + $0x68] sm:$0xff]  }
   0x4   :  { %420 = vmatprep.subr.bf16.mxu0 %v463_v3  ;;  %v468_v8 = vld [vmem:[%s626_s0 + $0x18] sm:$0xff]   ;;  %v470_v10 = vld [vmem:[%s626_s0 + $0x20] sm:$0xff]   ;;  %v472_v13 = vld [vmem:[%s626_s0 + $0x28] sm:$0xff]  }
   0x5   :  { %v476_v11 = vld [vmem:[%s626_s0 + $0x80] sm:$0xff]   ;;  %v473_v14 = vld [vmem:[%s626_s0 + $0x70] sm:$0xff]   ;;  %v481_v16 = vld [vmem:[%s626_s0 + $0x88] sm:$0xff]  }
   0x6   :  { %450 = vmatprep.subr.bf16.mxu1 %v476_v11  ;;  %v480_v15 = vld [vmem:[%s627_s1 + $0x4] ss:$12 sps:$4 sm:$0xff]   ;;  %v482_v17 = vld [vmem:[%s627_s1 + $0x8] ss:$12 sps:$4 sm:$0xff]   ;;  %v483_v18 = vld [vmem:[%s627_s1 + $0x20] ss:$12 sps:$4 sm:$0xff]  }
   0x7   :  { %421 = vmatpush3.bf16.msra.mxu0 %v464_v4  ;;  %451 = vmatpush3.bf16.msra.mxu1 %v476_v11  ;;  %v59_v19 = vld [vmem:[%s628_s2] sm:$0xff]  ;;  %v474_v20 = vld [vmem:[%s626_s0 + $0x30] sm:$0xff]   ;;  %v475_v22 = vld [vmem:[%s626_s0 + $0x78] sm:$0xff]  }
   0x8   :  { %422 = vmatprep.subr.bf16.mxu0 %v465_v5  ;;  %260 = vmatprep.mubr.bf16.mxu0 %v480_v15  ;;  %v61_v21 = vld [vmem:[%s628_s2 + $0x10] sm:$0xff]  ;;  %v60_v23 = vld [vmem:[%s628_s2 + $0x8] sm:$0xff]  ;;  %v62_v24 = vld [vmem:[%s628_s2 + $0x18] sm:$0xff] }
   0x9   :  { %452 = vmatprep.subr.bf16.mxu1 %v481_v16  ;;  %454 = vmatprep.mubr.msk.bf16.mxu1 %vm221_vm0, %v482_v17  ;;  %v477_v25 = vld [vmem:[%s626_s0 + $0x38] sm:$0xff]   ;;  %v478_v26 = vld [vmem:[%s627_s1] ss:$12 sps:$4 sm:$0xff]  }
   0xa   :  { %65 = vperm.xlu0 %459, %v59_v19   ;;  %75 = vperm.xlu1 %460, %v61_v21   ;;  %v484_v27 = vld [vmem:[%s627_s1 + $0x1c] ss:$12 sps:$4 sm:$0xff]   ;;  %v486_v28 = vld [vmem:[%s627_s1 + $0x18] ss:$12 sps:$4 sm:$0xff]  }
   0xb   :  { %423 = vmatpush3.bf16.msra.mxu0 %v466_v6  ;;  %453 = vmatpush3.bf16.msra.mxu1 %v481_v16 }
   0xc   :  { %424 = vmatprep.subr.bf16.mxu0 %v467_v7 }
   0xe   :  { %455 = vmatmul.mubr.msk.bf16.vlgmr.msra.gmra.mrb[0].mxu1 %vm221_vm0, %v483_v18  ;;  %70 = vperm.xlu0 %459, %v60_v23  }
   0xf   :  { %425 = vmatpush3.bf16.msra.mxu0 %v468_v8  ;;  %80 = vperm.xlu1 %460, %v62_v24  }
  0x10   :  { %426 = vmatprep.subr.bf16.mxu0 %v469_v9 }
  0x13   :  { %427 = vmatpush3.bf16.msra.mxu0 %v470_v10 }
  0x14   :  { %428 = vmatprep.subr.bf16.mxu0 %v471_v12 }
  0x17   :  { %429 = vmatpush3.bf16.msra.mxu0 %v472_v13 }
  0x18   :  { %430 = vmatprep.subr.bf16.mxu0 %v473_v14 }
  0x1b   :  { %431 = vmatpush3.bf16.msra.mxu0 %v474_v20 }
  0x1c   :  { %432 = vmatprep.subr.bf16.mxu0 %v475_v22 }
  0x1f   :  { %433 = vmatpush3.bf16.msra.mxu0 %v477_v25 }
  0x22   :  { %261 = vmatmul.mubr.bf16.vlgmr.msra.gmra.mrb[0].mxu0 %v478_v26 }
  0x23   :  { %268 = vmatprep.mubr.bf16.mxu0 %v484_v27 }
  0x2a   :  { %269 = vmatmul.mubr.bf16.gmra.mrb[4].mxu0 %v486_v28 }
  0x89   :  { %v66_v33 = vpop.permute.xlu0 %65  ;;  %v76_v44 = vpop.permute.xlu1 %75 }
  0x8d   :  { %v71_v39 = vpop.permute.xlu0 %70 }
  0x8e   :  { %v81_v55 = vpop.permute.xlu1 %80 }
  0xe1   :  { %v456_v29 = vpop.f32.mrb[0].mxu1 }
  0xe2   :  { %v311_v30 = vpop.f32.mrb[1].mxu1 }
  0xe3   :  { %v457_v31 = vpop.f32.mrb[2].mxu1 }
  0xe4   :  { %v314_v32 = vpop.f32.mrb[3].mxu1 }
  0xf5   :  { %v434_v34 = vpop.f32.mrb[0].mxu0 }
  0xf6   :  { %v435_v35 = vpop.f32.mrb[1].mxu0 }
  0xf7   :  { %v436_v36 = vadd.f32 %v435_v35, %v434_v34  ;;  %v437_v37 = vpop.f32.mrb[2].mxu0 }
  0xf8   :  { %v438_v38 = vpop.f32.mrb[3].mxu0 }
  0xf9   :  { %v439_v40 = vadd.f32 %v438_v38, %v437_v37  ;;  %v263_v41 = vadd.f32 %v436_v36, %v66_v33 }
  0xfb   :  { %v266_v42 = vadd.f32 %v439_v40, %v71_v39  ;;  %v312_v43 = vadd.f32 %v311_v30, %v263_v41 }
  0xfd   :  { %v315_v45 = vadd.f32 %v314_v32, %v266_v42  ;;  %v440_v46 = vpop.f32.mrb[4].mxu0  ;;  %v327_v47 = vsel %vm326_vm1, %v312_v43, 0.0 }
  0xfe   :  { %v441_v48 = vpop.f32.mrb[5].mxu0  ;;  %328 = vadd.xlane.f32.xlu0 %v327_v47 }
  0xff   :  { %v442_v49 = vadd.f32 %v441_v48, %v440_v46  ;;  %v443_v50 = vpop.f32.mrb[6].mxu0  ;;  %v330_v51 = vsel %vm326_vm1, %v315_v45, 0.0 }
 0x100   :  { %v444_v52 = vpop.f32.mrb[7].mxu0  ;;  %331 = vadd.xlane.f32.xlu1 %v330_v51 }
 0x101   :  { %v271_v53 = vadd.f32 %v442_v49, %v76_v44  ;;  %v445_v54 = vadd.f32 %v444_v52, %v443_v50 }
 0x103   :  { %v274_v56 = vadd.f32 %v445_v54, %v81_v55  ;;  %v320_v57 = vadd.f32 %v456_v29, %v271_v53 }
 0x105   :  { %v333_v58 = vsel %vm326_vm1, %v320_v57, 0.0  ;;  %v323_v59 = vadd.f32 %v457_v31, %v274_v56 }
 0x106   :  { %334 = vadd.xlane.f32.xlu0 %v333_v58 }
 0x107   :  { %v336_v60 = vsel %vm326_vm1, %v323_v59, 0.0 }
 0x10a   :  { %337 = vadd.xlane.f32.xlu0 %v336_v60 }
 0x18b   :  { %v329_v61 = vpop.xlane.xlu0 %328 }
 0x18c   :  { %v340_v62 = vmul.f32 0.125, %v329_v61 }
 0x18d   :  { %v332_v63 = vpop.xlane.xlu1 %331 }
 0x18e   :  { %v344_v0 = vsub.f32 %v312_v43, %v340_v62  ;;  %v341_v1 = vmul.f32 0.125, %v332_v63 }
 0x190   :  { %v345_v2 = vsub.f32 %v315_v45, %v341_v1  ;;  %v348_v3 = vmul.f32 %v344_v0, %v344_v0 }
 0x192   :  { %v352_v4 = vsel %vm326_vm1, %v348_v3, 0.0  ;;  %v349_v5 = vmul.f32 %v345_v2, %v345_v2 }
 0x193   :  { %353 = vadd.xlane.f32.xlu1 %v352_v4  ;;  %v335_v6 = vpop.xlane.xlu0 %334 }
 0x194   :  { %v342_v7 = vmul.f32 0.125, %v335_v6  ;;  %v355_v8 = vsel %vm326_vm1, %v349_v5, 0.0 }
 0x195   :  { %356 = vadd.xlane.f32.xlu0 %v355_v8 }
 0x196   :  { %v346_v9 = vsub.f32 %v320_v57, %v342_v7 }
 0x197   :  { %v338_v10 = vpop.xlane.xlu0 %337 }
 0x198   :  { %v343_v11 = vmul.f32 0.125, %v338_v10  ;;  %v350_v12 = vmul.f32 %v346_v9, %v346_v9 }
 0x19a   :  { %v347_v13 = vsub.f32 %v323_v59, %v343_v11  ;;  %v358_v14 = vsel %vm326_vm1, %v350_v12, 0.0 }
 0x19b   :  { %359 = vadd.xlane.f32.xlu1 %v358_v14 }
 0x19c   :  { %v351_v15 = vmul.f32 %v347_v13, %v347_v13 }
 0x19e   :  { %v361_v16 = vsel %vm326_vm1, %v351_v15, 0.0 }
 0x19f   :  { %362 = vadd.xlane.f32.xlu0 %v361_v16 }
 0x220   :  { %v354_v17 = vpop.xlane.xlu1 %353 }
 0x221   :  { %v364_v18 = vmul.f32 0.125, %v354_v17 }
 0x222   :  { %v357_v19 = vpop.xlane.xlu0 %356 }
 0x223   :  { %v368_v20 = vadd.f32 1e-05, %v364_v18  ;;  %v365_v21 = vmul.f32 0.125, %v357_v19 }
 0x225   :  { %487 = vrsqrt.f32 %v368_v20  ;;  %v369_v22 = vadd.f32 1e-05, %v365_v21 }
 0x227   :  { %489 = vrsqrt.f32 %v369_v22 }
 0x228   :  { %v360_v23 = vpop.xlane.xlu1 %359 }
 0x229   :  { %v366_v24 = vmul.f32 0.125, %v360_v23 }
 0x22b   :  { %v370_v25 = vadd.f32 1e-05, %v366_v24 }
 0x22c   :  { %v363_v26 = vpop.xlane.xlu0 %362 }
 0x22d   :  { %491 = vrsqrt.f32 %v370_v25  ;;  %v367_v27 = vmul.f32 0.125, %v363_v26 }
 0x22f   :  { %v488_v28 = vpop.eup %487  ;;  %v371_v29 = vadd.f32 1e-05, %v367_v27 }
 0x230   :  { %v376_v30 = vmul.f32 %v488_v28, %v344_v0 }
 0x231   :  { %v490_v31 = vpop.eup %489  ;;  %493 = vrsqrt.f32 %v371_v29 }
 0x232   :  { %v380_v32 = vmax.f32 %v376_v30, 0.0  ;;  %v377_v33 = vmul.f32 %v490_v31, %v345_v2 }
 0x234   :  { %384 = vst.msk [vmem:[%s629_s3] sm:$0xff] %vm326_vm1, %v380_v32  ;;  %v381_v34 = vmax.f32 %v377_v33, 0.0 }
 0x236   :  { %385 = vst.msk [vmem:[%s629_s3 + $0x8] sm:$0xff] %vm326_vm1, %v381_v34 }
 0x237   :  { %v492_v35 = vpop.eup %491 }
 0x238   :  { %v378_v36 = vmul.f32 %v492_v35, %v346_v9 }
 0x23a   :  { %v382_v37 = vmax.f32 %v378_v36, 0.0 }
 0x23b   :  { %v494_v38 = vpop.eup %493 }
 0x23c   :  { %386 = vst.msk [vmem:[%s629_s3 + $0x10] sm:$0xff] %vm326_vm1, %v382_v37  ;;  %v379_v39 = vmul.f32 %v494_v38, %v347_v13 }
 0x23e   :  { %v383_v40 = vmax.f32 %v379_v39, 0.0 }
 0x240   :  { %387 = vst.msk [vmem:[%s629_s3 + $0x18] sm:$0xff] %vm326_vm1, %v383_v40 }

// kernel: generator_forward.18
= control target key start
LH: loop header
LB: loop body
LE: loop exit
PB: predicated region body
PF: predicated region fallthrough
CT: control target
= control target key end

     0   :  { %v502_v1 = vmov 0   ;;  %vm224_vm0 = vcmask 261120   ;;  %vm329_vm1 = vcmask 64512   ;;  %s650_s0 = inlined_call_operand.vmem [shape: bf16[288,8], index: 0, kind: input, shape index: {}]   ;;  %s651_s1 = inlined_call_operand.vmem [shape: bf16[32,288], index: 1, kind: input, shape index: {}]   ;;  %s652_s2 = inlined_call_operand.vmem [shape: f32[32,1], index: 2, kind: input, shape index: {}]   ;;  %s653_s3 = inlined_call_operand.vmem [shape: f32[32,8], index: 3, kind: input, shape index: {}]   ;;  %s654_s4 = inlined_call_operand.vmem [shape: f32[32,8], index: 4, kind: output, shape index: {}]  }
   0x1   :  { %v468_v0 = vld [vmem:[%s650_s0 + $0x40] sm:$0xff]   ;;  %466 = vset.pattern.permute.xlu0 %v502_v1  ;;  %467 = vset.pattern.permute.xlu1 %v502_v1  ;;  %v470_v3 = vld [vmem:[%s650_s0 + $0x48] sm:$0xff]   ;;  %v472_v5 = vld [vmem:[%s650_s0 + $0x50] sm:$0xff]  }
   0x2   :  { %v469_v2 = vld [vmem:[%s650_s0] sm:$0xff]   ;;  %425 = vmatprep.subr.bf16.mxu0 %v468_v0  ;;  %v471_v4 = vld [vmem:[%s650_s0 + $0x8] sm:$0xff]   ;;  %v473_v6 = vld [vmem:[%s650_s0 + $0x10] sm:$0xff]  }
   0x3   :  { %426 = vmatpush3.bf16.msra.mxu0 %v469_v2  ;;  %v474_v7 = vld [vmem:[%s650_s0 + $0x58] sm:$0xff]   ;;  %v476_v9 = vld [vmem:[%s650_s0 + $0x60] sm:$0xff]   ;;  %v478_v12 = vld [vmem:[%s650_s0 + $0x68] sm:$0xff]  }
   0x4   :  { %427 = vmatprep.subr.bf16.mxu0 %v470_v3  ;;  %v475_v8 = vld [vmem:[%s650_s0 + $0x18] sm:$0xff]   ;;  %v477_v10 = vld [vmem:[%s650_s0 + $0x20] sm:$0xff]   ;;  %v479_v13 = vld [vmem:[%s650_s0 + $0x28] sm:$0xff]  }
   0x5   :  { %v483_v11 = vld [vmem:[%s650_s0 + $0x80] sm:$0xff]   ;;  %v480_v14 = vld [vmem:[%s650_s0 + $0x70] sm:$0xff]   ;;  %v488_v16 = vld [vmem:[%s650_s0 + $0x88] sm:$0xff]  }
   0x6   :  { %457 = vmatprep.subr.bf16.mxu1 %v483_v11  ;;  %v487_v15 = vld [vmem:[%s651_s1 + $0x4] ss:$12 sps:$4 sm:$0xff]   ;;  %v489_v17 = vld [vmem:[%s651_s1 + $0x8] ss:$12 sps:$4 sm:$0xff]   ;;  %v490_v18 = vld [vmem:[%s651_s1 + $0x20] ss:$12 sps:$4 sm:$0xff]  }
   0x7   :  { %428 = vmatpush3.bf16.msra.mxu0 %v471_v4  ;;  %458 = vmatpush3.bf16.msra.mxu1 %v483_v11  ;;  %v62_v19 = vld [vmem:[%s652_s2] sm:$0xff]  ;;  %v481_v20 = vld [vmem:[%s650_s0 + $0x30] sm:$0xff]   ;;  %v482_v22 = vld [vmem:[%s650_s0 + $0x78] sm:$0xff]  }
   0x8   :  { %429 = vmatprep.subr.bf16.mxu0 %v472_v5  ;;  %263 = vmatprep.mubr.bf16.mxu0 %v487_v15  ;;  %v64_v21 = vld [vmem:[%s652_s2 + $0x10] sm:$0xff]  ;;  %v63_v23 = vld [vmem:[%s652_s2 + $0x8] sm:$0xff]  ;;  %v65_v24 = vld [vmem:[%s652_s2 + $0x18] sm:$0xff] }
   0x9   :  { %459 = vmatprep.subr.bf16.mxu1 %v488_v16  ;;  %461 = vmatprep.mubr.msk.bf16.mxu1 %vm224_vm0, %v489_v17  ;;  %v484_v25 = vld [vmem:[%s650_s0 + $0x38] sm:$0xff]   ;;  %v485_v26 = vld [vmem:[%s651_s1] ss:$12 sps:$4 sm:$0xff]  }
   0xa   :  { %68 = vperm.xlu0 %466, %v62_v19   ;;  %78 = vperm.xlu1 %467, %v64_v21   ;;  %v491_v27 = vld [vmem:[%s651_s1 + $0x1c] ss:$12 sps:$4 sm:$0xff]   ;;  %v493_v28 = vld [vmem:[%s651_s1 + $0x18] ss:$12 sps:$4 sm:$0xff]  }
   0xb   :  { %430 = vmatpush3.bf16.msra.mxu0 %v473_v6  ;;  %460 = vmatpush3.bf16.msra.mxu1 %v488_v16 }
   0xc   :  { %431 = vmatprep.subr.bf16.mxu0 %v474_v7 }
   0xe   :  { %462 = vmatmul.mubr.msk.bf16.vlgmr.msra.gmra.mrb[0].mxu1 %vm224_vm0, %v490_v18  ;;  %73 = vperm.xlu0 %466, %v63_v23  }
   0xf   :  { %432 = vmatpush3.bf16.msra.mxu0 %v475_v8  ;;  %83 = vperm.xlu1 %467, %v65_v24  }
  0x10   :  { %433 = vmatprep.subr.bf16.mxu0 %v476_v9 }
  0x13   :  { %434 = vmatpush3.bf16.msra.mxu0 %v477_v10 }
  0x14   :  { %435 = vmatprep.subr.bf16.mxu0 %v478_v12 }
  0x17   :  { %436 = vmatpush3.bf16.msra.mxu0 %v479_v13 }
  0x18   :  { %437 = vmatprep.subr.bf16.mxu0 %v480_v14 }
  0x1b   :  { %438 = vmatpush3.bf16.msra.mxu0 %v481_v20 }
  0x1c   :  { %439 = vmatprep.subr.bf16.mxu0 %v482_v22 }
  0x1f   :  { %440 = vmatpush3.bf16.msra.mxu0 %v484_v25 }
  0x22   :  { %264 = vmatmul.mubr.bf16.vlgmr.msra.gmra.mrb[0].mxu0 %v485_v26 }
  0x23   :  { %271 = vmatprep.mubr.bf16.mxu0 %v491_v27 }
  0x2a   :  { %272 = vmatmul.mubr.bf16.gmra.mrb[4].mxu0 %v493_v28 }
  0x89   :  { %v69_v33 = vpop.permute.xlu0 %68  ;;  %v79_v44 = vpop.permute.xlu1 %78 }
  0x8d   :  { %v74_v39 = vpop.permute.xlu0 %73 }
  0x8e   :  { %v84_v55 = vpop.permute.xlu1 %83 }
  0xe1   :  { %v463_v29 = vpop.f32.mrb[0].mxu1 }
  0xe2   :  { %v314_v30 = vpop.f32.mrb[1].mxu1 }
  0xe3   :  { %v464_v31 = vpop.f32.mrb[2].mxu1 }
  0xe4   :  { %v317_v32 = vpop.f32.mrb[3].mxu1 }
  0xf5   :  { %v441_v34 = vpop.f32.mrb[0].mxu0 }
  0xf6   :  { %v442_v35 = vpop.f32.mrb[1].mxu0 }
  0xf7   :  { %v443_v36 = vadd.f32 %v442_v35, %v441_v34  ;;  %v444_v37 = vpop.f32.mrb[2].mxu0 }
  0xf8   :  { %v445_v38 = vpop.f32.mrb[3].mxu0 }
  0xf9   :  { %v446_v40 = vadd.f32 %v445_v38, %v444_v37  ;;  %v266_v41 = vadd.f32 %v443_v36, %v69_v33  ;;  %v384_v33 = vld [vmem:[%s653_s3 + $0x8] sm:$0xff]  ;;  %v385_v38 = vld [vmem:[%s653_s3 + $0x10] sm:$0xff] }
  0xfb   :  { %v269_v42 = vadd.f32 %v446_v40, %v74_v39  ;;  %v315_v43 = vadd.f32 %v314_v30, %v266_v41 }
  0xfd   :  { %v318_v45 = vadd.f32 %v317_v32, %v269_v42  ;;  %v447_v46 = vpop.f32.mrb[4].mxu0  ;;  %v330_v47 = vsel %vm329_vm1, %v315_v43, 0.0  ;;  %v386_v42 = vld [vmem:[%s653_s3 + $0x18] sm:$0xff] }
  0xfe   :  { %v448_v48 = vpop.f32.mrb[5].mxu0  ;;  %331 = vadd.xlane.f32.xlu0 %v330_v47 }
  0xff   :  { %v449_v49 = vadd.f32 %v448_v48, %v447_v46  ;;  %v450_v50 = vpop.f32.mrb[6].mxu0  ;;  %v333_v51 = vsel %vm329_vm1, %v318_v45, 0.0 }
 0x100   :  { %v451_v52 = vpop.f32.mrb[7].mxu0  ;;  %334 = vadd.xlane.f32.xlu1 %v333_v51 }
 0x101   :  { %v274_v53 = vadd.f32 %v449_v49, %v79_v44  ;;  %v452_v54 = vadd.f32 %v451_v52, %v450_v50 }
 0x103   :  { %v277_v56 = vadd.f32 %v452_v54, %v84_v55  ;;  %v323_v57 = vadd.f32 %v463_v29, %v274_v53  ;;  %v383_v29 = vld [vmem:[%s653_s3] sm:$0xff] }
 0x105   :  { %v336_v58 = vsel %vm329_vm1, %v323_v57, 0.0  ;;  %v326_v59 = vadd.f32 %v464_v31, %v277_v56 }
 0x106   :  { %337 = vadd.xlane.f32.xlu0 %v336_v58 }
 0x107   :  { %v339_v60 = vsel %vm329_vm1, %v326_v59, 0.0 }
 0x10a   :  { %340 = vadd.xlane.f32.xlu0 %v339_v60 }
 0x18b   :  { %v332_v61 = vpop.xlane.xlu0 %331 }
 0x18c   :  { %v343_v62 = vmul.f32 0.125, %v332_v61 }
 0x18d   :  { %v335_v63 = vpop.xlane.xlu1 %334 }
 0x18e   :  { %v347_v0 = vsub.f32 %v315_v43, %v343_v62  ;;  %v344_v1 = vmul.f32 0.125, %v335_v63 }
 0x190   :  { %v348_v2 = vsub.f32 %v318_v45, %v344_v1  ;;  %v351_v3 = vmul.f32 %v347_v0, %v347_v0 }
 0x192   :  { %v355_v4 = vsel %vm329_vm1, %v351_v3, 0.0  ;;  %v352_v5 = vmul.f32 %v348_v2, %v348_v2 }
 0x193   :  { %356 = vadd.xlane.f32.xlu1 %v355_v4  ;;  %v338_v6 = vpop.xlane.xlu0 %337 }
 0x194   :  { %v345_v7 = vmul.f32 0.125, %v338_v6  ;;  %v358_v8 = vsel %vm329_vm1, %v352_v5, 0.0 }
 0x195   :  { %359 = vadd.xlane.f32.xlu0 %v358_v8 }
 0x196   :  { %v349_v9 = vsub.f32 %v323_v57, %v345_v7 }
 0x197   :  { %v341_v10 = vpop.xlane.xlu0 %340 }
 0x198   :  { %v346_v11 = vmul.f32 0.125, %v341_v10  ;;  %v353_v12 = vmul.f32 %v349_v9, %v349_v9 }
 0x19a   :  { %v350_v13 = vsub.f32 %v326_v59, %v346_v11  ;;  %v361_v14 = vsel %vm329_vm1, %v353_v12, 0.0 }
 0x19b   :  { %362 = vadd.xlane.f32.xlu1 %v361_v14 }
 0x19c   :  { %v354_v15 = vmul.f32 %v350_v13, %v350_v13 }
 0x19e   :  { %v364_v16 = vsel %vm329_vm1, %v354_v15, 0.0 }
 0x19f   :  { %365 = vadd.xlane.f32.xlu0 %v364_v16 }
 0x220   :  { %v357_v17 = vpop.xlane.xlu1 %356 }
 0x221   :  { %v367_v18 = vmul.f32 0.125, %v357_v17 }
 0x222   :  { %v360_v19 = vpop.xlane.xlu0 %359 }
 0x223   :  { %v371_v20 = vadd.f32 1e-05, %v367_v18  ;;  %v368_v21 = vmul.f32 0.125, %v360_v19 }
 0x225   :  { %494 = vrsqrt.f32 %v371_v20  ;;  %v372_v22 = vadd.f32 1e-05, %v368_v21 }
 0x227   :  { %496 = vrsqrt.f32 %v372_v22 }
 0x228   :  { %v363_v23 = vpop.xlane.xlu1 %362 }
 0x229   :  { %v369_v24 = vmul.f32 0.125, %v363_v23 }
 0x22b   :  { %v373_v25 = vadd.f32 1e-05, %v369_v24 }
 0x22c   :  { %v366_v26 = vpop.xlane.xlu0 %365 }
 0x22d   :  { %498 = vrsqrt.f32 %v373_v25  ;;  %v370_v27 = vmul.f32 0.125, %v366_v26 }
 0x22f   :  { %v495_v28 = vpop.eup %494  ;;  %v374_v30 = vadd.f32 1e-05, %v370_v27 }
 0x230   :  { %v379_v31 = vmul.f32 %v495_v28, %v347_v0 }
 0x231   :  { %v497_v32 = vpop.eup %496  ;;  %500 = vrsqrt.f32 %v374_v30 }
 0x232   :  { %v387_v34 = vadd.f32 %v383_v29, %v379_v31  ;;  %v380_v35 = vmul.f32 %v497_v32, %v348_v2 }
 0x234   :  { %391 = vst.msk [vmem:[%s654_s4] sm:$0xff] %vm329_vm1, %v387_v34  ;;  %v388_v36 = vadd.f32 %v384_v33, %v380_v35 }
 0x236   :  { %392 = vst.msk [vmem:[%s654_s4 + $0x8] sm:$0xff] %vm329_vm1, %v388_v36 }
 0x237   :  { %v499_v37 = vpop.eup %498 }
 0x238   :  { %v381_v39 = vmul.f32 %v499_v37, %v349_v9 }
 0x23a   :  { %v389_v40 = vadd.f32 %v385_v38, %v381_v39 }
 0x23b   :  { %v501_v41 = vpop.eup %500 }
 0x23c   :  { %393 = vst.msk [vmem:[%s654_s4 + $0x10] sm:$0xff] %vm329_vm1, %v389_v40  ;;  %v382_v43 = vmul.f32 %v501_v41, %v350_v13 }
 0x23e   :  { %v390_v44 = vadd.f32 %v386_v42, %v382_v43 }
 0x240   :  { %394 = vst.msk [vmem:[%s654_s4 + $0x18] sm:$0xff] %vm329_vm1, %v390_v44 }

// kernel: generator_forward.25
= control target key start
LH: loop header
LB: loop body
LE: loop exit
PB: predicated region body
PF: predicated region fallthrough
CT: control target
= control target key end

     0   :  { %v828_v1 = vmov 0.0   ;;  %vm829_vm0 = vmmov 0   ;;  %v830_v3 = vmov 0   ;;  %vm196_vm1 = vcmask 261120   ;;  %s978_s0 = inlined_call_operand.vmem [shape: bf16[288,50], index: 0, kind: input, shape index: {}]   ;;  %s979_s1 = inlined_call_operand.vmem [shape: bf16[16,288], index: 1, kind: input, shape index: {}]   ;;  %s980_s2 = inlined_call_operand.vmem [shape: f32[16,1], index: 2, kind: input, shape index: {}]   ;;  %s981_s3 = inlined_call_operand.vmem [shape: f32[50,2], index: 3, kind: input, shape index: {}]   ;;  %s982_s4 = inlined_call_operand.vmem [shape: f32[2,50], index: 4, kind: input, shape index: {}]   ;;  %s983_s5 = inlined_call_operand.vmem [shape: f32[16,50], index: 5, kind: output, shape index: {}]  }
   0x1   :  { %v802_v0 = vld [vmem:[%s978_s0 + $0x40] sm:$0xff]   ;;  %722 = vmatprep.subr.bf16.mxu1 %v828_v1  ;;  %726 = vmatprep.mubr.msk.bf16.mxu1 %vm829_vm0, %v828_v1  ;;  %v804_v4 = vld [vmem:[%s978_s0 + $0x48] sm:$0xff]   ;;  %v806_v6 = vld [vmem:[%s978_s0 + $0x50] sm:$0xff]   ;;  %vm297_vm2 = vcmask 1041408   ;;  %vm290_vm3 = vcmask 408576   ;;  %vm376_vm4 = vcmask 15360  }
   0x2   :  { %v803_v2 = vld [vmem:[%s978_s0] sm:$0xff]   ;;  %801 = vset.pattern.permute.xlu0 %v830_v3  ;;  %673 = vmatprep.subr.bf16.mxu0 %v802_v0  ;;  %v805_v5 = vld [vmem:[%s978_s0 + $0x8] sm:$0xff]   ;;  %v807_v7 = vld [vmem:[%s978_s0 + $0x10] sm:$0xff]  }
   0x3   :  { %674 = vmatpush3.bf16.msra.mxu0 %v803_v2  ;;  %v808_v8 = vld [vmem:[%s978_s0 + $0x58] sm:$0xff]   ;;  %v810_v10 = vld [vmem:[%s978_s0 + $0x60] sm:$0xff]   ;;  %v812_v13 = vld [vmem:[%s978_s0 + $0x68] sm:$0xff]  }
   0x4   :  { %675 = vmatprep.subr.bf16.mxu0 %v804_v4  ;;  %v809_v9 = vld [vmem:[%s978_s0 + $0x18] sm:$0xff]   ;;  %v816_v11 = vld [vmem:[%s978_s0 + $0x80] sm:$0xff]   ;;  %v813_v14 = vld [vmem:[%s978_s0 + $0x28] sm:$0xff]  }
   0x5   :  { %v811_v12 = vld [vmem:[%s978_s0 + $0x20] sm:$0xff]   ;;  %723 = vmatpush3.bf16.msra.mxu1 %v816_v11  ;;  %v822_v16 = vld [vmem:[%s978_s0 + $0x88] sm:$0xff]   ;;  %v814_v17 = vld [vmem:[%s978_s0 + $0x70] sm:$0xff]  }
   0x6   :  { %724 = vmatprep.subr.bf16.mxu1 %v828_v1  ;;  %v821_v15 = vld [vmem:[%s979_s1 + $0x4] ss:$12 sps:$4 sm:$0xff]   ;;  %v823_v18 = vld [vmem:[%s979_s1 + $0x8] ss:$12 sps:$4 sm:$0xff]   ;;  %v285_v25 = vld [vmem:[%s981_s3 + $0x18] sm:$0xff] }
   0x7   :  { %676 = vmatpush3.bf16.msra.mxu0 %v805_v5  ;;  %232 = vmatprep.mubr.bf16.mxu0 %v821_v15  ;;  %v61_v19 = vld [vmem:[%s980_s2] sm:$0xff]  ;;  %v283_v21 = vld [vmem:[%s981_s3 + $0x8] sm:$0xff]  ;;  %v284_v22 = vld [vmem:[%s981_s3 + $0x10] sm:$0xff] }
   0x8   :  { %677 = vmatprep.subr.bf16.mxu0 %v806_v6  ;;  %65 = vperm.xlu0 %801, %v61_v19   ;;  %v282_v20 = vld [vmem:[%s981_s3] sm:$0xff]  ;;  %v62_v23 = vld [vmem:[%s980_s2 + $0x8] sm:$0xff]  ;;  %v815_v26 = vld [vmem:[%s978_s0 + $0x30] sm:$0xff]   ;;  %v778_v27 = vpack.c.bf16 %v285_v25, %v284_v22 }
   0x9   :  { %725 = vmatpush3.bf16.msra.mxu1 %v822_v16  ;;  %v774_v24 = vpack.c.bf16 %v283_v21, %v282_v20  ;;  %v817_v28 = vld [vmem:[%s978_s0 + $0x78] sm:$0xff]   ;;  %v819_v30 = vld [vmem:[%s979_s1] ss:$12 sps:$4 sm:$0xff]   ;;  %v288_v34 = vld [vmem:[%s981_s3 + $0x30] sm:$0x3] }
   0xa   :  { %v818_v29 = vld [vmem:[%s978_s0 + $0x38] sm:$0xff]   ;;  %v286_v31 = vld [vmem:[%s981_s3 + $0x20] sm:$0xff]  ;;  %v287_v32 = vld [vmem:[%s981_s3 + $0x28] sm:$0xff] }
   0xb   :  { %678 = vmatpush3.bf16.msra.mxu0 %v807_v7  ;;  %775 = vmatprep.subr.bf16.mxu1 %v774_v24  ;;  %v782_v33 = vpack.c.bf16 %v287_v32, %v286_v31  ;;  %v289_v35 = vld [vmem:[%s982_s4] sm:$0x3] }
   0xc   :  { %679 = vmatprep.subr.bf16.mxu0 %v808_v8  ;;  %727 = vmatmul.mubr.msk.bf16.vlgmr.msra.gmra.mrb[0].mxu1 %vm196_vm1, %v823_v18 }
   0xd   :  { %70 = vperm.xlu0 %801, %v62_v23   ;;  %777 = vmatpush3.bf16.msra.mxu1 %v774_v24 }
   0xe   :  { %779 = vmatprep.subr.bf16.mxu1 %v778_v27 }
   0xf   :  { %680 = vmatpush3.bf16.msra.mxu0 %v809_v9 }
  0x10   :  { %681 = vmatprep.subr.bf16.mxu0 %v810_v10 }
  0x11   :  { %781 = vmatpush3.bf16.msra.mxu1 %v778_v27 }
  0x12   :  { %783 = vmatprep.subr.bf16.mxu1 %v782_v33 }
  0x13   :  { %682 = vmatpush3.bf16.msra.mxu0 %v811_v12 }
  0x14   :  { %683 = vmatprep.subr.bf16.mxu0 %v812_v13 }
  0x15   :  { %785 = vmatpush3.bf16.msra.mxu1 %v782_v33 }
  0x16   :  { %742 = vmatprep.subr.msk.mxu1 %vm297_vm2, %v288_v34 }
  0x17   :  { %684 = vmatpush3.bf16.msra.mxu0 %v813_v14 }
  0x18   :  { %685 = vmatprep.subr.bf16.mxu0 %v814_v17 }
  0x19   :  { %743 = vmatpush3.msk.msra.mxu1 %vm297_vm2, %v288_v34 }
  0x1a   :  { %747 = vmatprep.subr.msk.mxu1 %vm297_vm2, %v289_v35 }
  0x1b   :  { %686 = vmatpush3.bf16.msra.mxu0 %v815_v26 }
  0x1c   :  { %687 = vmatprep.subr.bf16.mxu0 %v817_v28 }
  0x1f   :  { %688 = vmatpush3.bf16.msra.mxu0 %v818_v29 }
  0x20   :  { %769 = vmatprep.subr.msk.mxu0 %vm297_vm2, %v289_v35 }
  0x22   :  { %233 = vmatmul.mubr.bf16.vlgmr.msra.gmra.mrb[0].mxu0 %v819_v30 }
  0x23   :  { %770 = vmatpush3.msk.msra.mxu0 %vm297_vm2, %v289_v35 }
  0x87   :  { %v66_v40 = vpop.permute.xlu0 %65 }
  0x8c   :  { %v71_v48 = vpop.permute.xlu0 %70 }
  0xdf   :  { %v275_v36 = vpop.f32.mrb[0].mxu1 }
  0xe0   :  { %v728_v37 = vpop.f32.mrb[1].mxu1 }
  0xe1   :  { %v278_v38 = vpop.f32.mrb[2].mxu1 }
  0xe2   :  { %v729_v39 = vpop.f32.mrb[3].mxu1 }
  0xf5   :  { %v689_v41 = vpop.f32.mrb[0].mxu0 }
  0xf6   :  { %v690_v42 = vpop.f32.mrb[1].mxu0 }
  0xf7   :  { %v691_v43 = vadd.f32 %v690_v42, %v689_v41  ;;  %v692_v44 = vpop.f32.mrb[2].mxu0 }
  0xf8   :  { %v693_v45 = vpop.f32.mrb[3].mxu0 }
  0xf9   :  { %v235_v46 = vadd.f32 %v691_v43, %v66_v40  ;;  %v694_v47 = vadd.f32 %v693_v45, %v692_v44 }
  0xfb   :  { %v276_v49 = vadd.f32 %v275_v36, %v235_v46  ;;  %v238_v50 = vadd.f32 %v694_v47, %v71_v48 }
  0xfd   :  { %v279_v51 = vadd.f32 %v278_v38, %v238_v50  ;;  %744 = vmatprep.mubr.msk.f32.mxu1 %vm290_vm3, %v276_v49 }
  0xff   :  { %745 = vmatmul.mubr.msk.f32.vlgmr.msra.gmra.mrb[4].mxu1 %vm290_vm3, %v279_v51 }
 0x100   :  { %748 = vmatpush3.msk.msra.mxu1 %vm297_vm2, %v289_v35 }
 0x101   :  { %787 = vmatprep.subr.bf16.mxu1 %v774_v24 }
 0x1d2   :  { %v746_v52 = vpop.f32.mrb[4].mxu1 }
 0x1d3   :  { %v367_v53 = vpop.f32.mrb[5].mxu1 }
 0x1d4   :  { %749 = vmatprep.mubr.msk.f32.mxu1 %vm376_vm4, %v367_v53 }
 0x1d5   :  { %750 = vmatmul.mubr.msk.f32.vlgmr.msra.gmra.mrb[6].mxu1 %vm376_vm4, %v746_v52 }
 0x1d6   :  { %789 = vmatpush3.bf16.msra.mxu1 %v774_v24 }
 0x1d7   :  { %791 = vmatprep.subr.bf16.mxu1 %v778_v27 }
 0x1da   :  { %793 = vmatpush3.bf16.msra.mxu1 %v778_v27 }
 0x1db   :  { %795 = vmatprep.subr.bf16.mxu1 %v782_v33 }
 0x1de   :  { %797 = vmatpush3.bf16.msra.mxu1 %v782_v33 }
 0x1df   :  { %764 = vmatprep.subr.msk.mxu1 %vm297_vm2, %v288_v34 }
 0x1e2   :  { %765 = vmatpush3.msk.msra.mxu1 %vm297_vm2, %v288_v34 }
 0x2a8   :  { %v751_v54 = vpop.f32.mrb[6].mxu1 }
 0x2a9   :  { %v462_v55 = vsub.f32 %v279_v51, %v751_v54  ;;  %v452_v56 = vpop.f32.mrb[7].mxu1 }
 0x2aa   :  { %v461_v57 = vsub.f32 %v276_v49, %v452_v56 }
 0x2ab   :  { %v464_v59 = vmul.f32 %v462_v55, %v462_v55 }
 0x2ac   :  { %v463_v58 = vmul.f32 %v461_v57, %v461_v57 }
 0x2ae   :  { %766 = vmatprep.mubr.msk.f32.mxu1 %vm290_vm3, %v463_v58 }
 0x2af   :  { %767 = vmatmul.mubr.msk.f32.vlgmr.msra.gmra.mrb[8].mxu1 %vm290_vm3, %v464_v59 }
 0x382   :  { %v768_v60 = vpop.f32.mrb[8].mxu1 }
 0x383   :  { %v537_v61 = vpop.f32.mrb[9].mxu1 }
 0x384   :  { %771 = vmatprep.mubr.msk.f32.mxu0 %vm376_vm4, %v537_v61 }
 0x385   :  { %772 = vmatmul.mubr.msk.f32.vlgmr.msra.gmra.mrb[4].mxu0 %vm376_vm4, %v768_v60 }
 0x458   :  { %v773_v62 = vpop.f32.mrb[4].mxu0 }
 0x459   :  { %v624_v63 = vadd.f32 1e-05, %v773_v62  ;;  %v618_v0 = vpop.f32.mrb[5].mxu0 }
 0x45a   :  { %v619_v1 = vadd.f32 1e-05, %v618_v0 }
 0x45b   :  { %824 = vrsqrt.f32 %v624_v63 }
 0x45c   :  { %826 = vrsqrt.f32 %v619_v1 }
 0x465   :  { %v825_v2 = vpop.eup %824 }
 0x466   :  { %v827_v3 = vpop.eup %826  ;;  %v630_v4 = vmul.f32 %v825_v2, %v462_v55 }
 0x467   :  { %v629_v5 = vmul.f32 %v827_v3, %v461_v57 }
 0x468   :  { %v632_v6 = vmax.f32 %v630_v4, 0.0 }
 0x469   :  { %v631_v7 = vmax.f32 %v629_v5, 0.0 }
 0x46a   :  { %634 = vst.msk [vmem:[%s983_s5 + $0x8] sm:$0xff] %vm290_vm3, %v632_v6 }
 0x46b   :  { %633 = vst.msk [vmem:[%s983_s5] sm:$0xff] %vm290_vm3, %v631_v7 }

// kernel: generator_forward.26
= control target key start
LH: loop header
LB: loop body
LE: loop exit
PB: predicated region body
PF: predicated region fallthrough
CT: control target
= control target key end

     0   :  { %v707_v1 = vmov 0   ;;  %v708_v2 = vmov 0.0|0.0   ;;  %vm142_vm0 = vcmask 130048   ;;  %vm223_vm1 = vcmask 1041408   ;;  %s949_s0 = inlined_call_operand.vmem [shape: bf16[144,242], index: 0, kind: input, shape index: {}]   ;;  %s950_s1 = inlined_call_operand.vmem [shape: bf16[8,144], index: 1, kind: input, shape index: {}]   ;;  %s951_s2 = inlined_call_operand.vmem [shape: f32[8,1], index: 2, kind: input, shape index: {}]   ;;  %s952_s3 = inlined_call_operand.vmem [shape: f32[242,2], index: 3, kind: input, shape index: {}]   ;;  %s953_s4 = inlined_call_operand.vmem [shape: f32[2,242], index: 4, kind: input, shape index: {}]   ;;  %s954_s5 = inlined_call_operand.vmem [shape: f32[8,242], index: 5, kind: output, shape index: {}]  }
   0x1   :  { %v674_v0 = vld [vmem:[%s949_s0 + $0x4] ss:$8 sps:$4 sm:$0xff]   ;;  %673 = vset.pattern.permute.xlu0 %v707_v1  ;;  %580 = vmatprep.subr.bf16.mxu1 %v708_v2  ;;  %v676_v3 = vld [vmem:[%s949_s0] ss:$8 sps:$4 sm:$0xff]   ;;  %v677_v4 = vld [vmem:[%s949_s0 + $0x14] ss:$8 sps:$4 sm:$0xff]  }
   0x2   :  { %146 = vmatprep.subr.bf16.mxu0 %v674_v0  ;;  %v679_v5 = vld [vmem:[%s949_s0 + $0x10] ss:$8 sps:$4 sm:$0xff]   ;;  %v680_v6 = vld [vmem:[%s949_s0 + $0x24] ss:$8 sps:$4 sm:$0xff]   ;;  %v682_v7 = vld [vmem:[%s949_s0 + $0x20] ss:$8 sps:$4 sm:$0xff]  }
   0x3   :  { %147 = vmatpush1.bf16.msra.mxu0 %v676_v3  ;;  %v683_v8 = vld [vmem:[%s949_s0 + $0x34] ss:$8 sps:$4 sm:$0xff]   ;;  %v685_v9 = vld [vmem:[%s949_s0 + $0x30] ss:$8 sps:$4 sm:$0xff]   ;;  %v686_v10 = vld [vmem:[%s949_s0 + $0x44] ss:$8 sps:$4 sm:$0xff]  }
   0x4   :  { %148 = vmatprep.subr.bf16.mxu0 %v677_v4  ;;  %v771_v11 = vld [vmem:[%s950_s1] sm:$0xff]  ;;  %v188_v15 = vld [vmem:[%s952_s3 + $0x8] sm:$0xff]  ;;  %v189_v16 = vld [vmem:[%s952_s3 + $0x10] sm:$0xff]  ;;  %vm219_vm2 = vcmask 932864   ;;  %vm306_vm3 = vcmask 15360  }
   0x5   :  { %v40_v12 = vld [vmem:[%s951_s2] sm:$0xff]  ;;  %v549_v14 = vcombine.high %v771_v11, %v771_v11  ;;  %v190_v17 = vld [vmem:[%s952_s3 + $0x18] sm:$0xff]  ;;  %v192_v23 = vld [vmem:[%s952_s3 + $0x28] sm:$0xff]  ;;  %v548_v43 = vcombine.low %v771_v11, %v771_v11 }
   0x6   :  { %v187_v13 = vld [vmem:[%s952_s3] sm:$0xff]  ;;  %43 = vperm.xlu0 %673, %v40_v12   ;;  %v689_v20 = vld [vmem:[%s949_s0 + $0x54] ss:$8 sps:$4 sm:$0xff]   ;;  %v584_v21 = vpack.c.bf16 %v190_v17, %v189_v16  ;;  %v691_v24 = vld [vmem:[%s949_s0 + $0x50] ss:$8 sps:$4 sm:$0xff]  }
   0x7   :  { %149 = vmatpush1.bf16.msra.mxu0 %v679_v5  ;;  %v581_v18 = vpack.c.bf16 %v188_v15, %v187_v13  ;;  %v688_v19 = vld [vmem:[%s949_s0 + $0x40] ss:$8 sps:$4 sm:$0xff]   ;;  %568 = vmatprep.mubr.msk.bf16.mxu0 %vm142_vm0, %v549_v14  ;;  %v692_v25 = vld [vmem:[%s949_s0 + $0x64] ss:$8 sps:$4 sm:$0xff]   ;;  %v193_v27 = vld [vmem:[%s952_s3 + $0x30] sm:$0xff] }
   0x8   :  { %150 = vmatprep.subr.bf16.mxu0 %v680_v6  ;;  %v191_v22 = vld [vmem:[%s952_s3 + $0x20] sm:$0xff]  ;;  %v194_v28 = vld [vmem:[%s952_s3 + $0x38] sm:$0xff]  ;;  %v196_v33 = vld [vmem:[%s952_s3 + $0x48] sm:$0xff]  ;;  %v709_v6 = vmov 0.0  }
   0x9   :  { %582 = vmatpush1.bf16.msra.mxu1 %v581_v18  ;;  %v587_v26 = vpack.c.bf16 %v192_v23, %v191_v22  ;;  %v694_v29 = vld [vmem:[%s949_s0 + $0x60] ss:$8 sps:$4 sm:$0xff]   ;;  %v695_v30 = vld [vmem:[%s949_s0 + $0x74] ss:$8 sps:$4 sm:$0xff]   ;;  %v590_v31 = vpack.c.bf16 %v194_v28, %v193_v27  ;;  %v697_v34 = vld [vmem:[%s949_s0 + $0x70] ss:$8 sps:$4 sm:$0xff]  }
   0xa   :  { %583 = vmatprep.subr.bf16.mxu1 %v708_v2  ;;  %v195_v32 = vld [vmem:[%s952_s3 + $0x40] sm:$0xff]  ;;  %v197_v37 = vld [vmem:[%s952_s3 + $0x50] sm:$0xff]  ;;  %v198_v38 = vld [vmem:[%s952_s3 + $0x58] sm:$0xff] }
   0xb   :  { %151 = vmatpush1.bf16.msra.mxu0 %v682_v7  ;;  %v698_v35 = vld [vmem:[%s949_s0 + $0x84] ss:$8 sps:$4 sm:$0xff]   ;;  %v593_v36 = vpack.c.bf16 %v196_v33, %v195_v32  ;;  %v700_v39 = vld [vmem:[%s949_s0 + $0x80] ss:$8 sps:$4 sm:$0xff]   ;;  %v596_v40 = vpack.c.bf16 %v198_v38, %v197_v37  ;;  %v201_v45 = vld [vmem:[%s952_s3 + $0x70] sm:$0xff] }
   0xc   :  { %152 = vmatprep.subr.bf16.mxu0 %v683_v8  ;;  %v199_v41 = vld [vmem:[%s952_s3 + $0x60] sm:$0xff]  ;;  %v200_v42 = vld [vmem:[%s952_s3 + $0x68] sm:$0xff]  ;;  %v202_v46 = vld [vmem:[%s952_s3 + $0x78] sm:$0xff] }
   0xd   :  { %585 = vmatpush1.bf16.msra.mxu1 %v584_v21  ;;  %v599_v44 = vpack.c.bf16 %v200_v42, %v199_v41  ;;  %v602_v47 = vpack.c.bf16 %v202_v46, %v201_v45  ;;  %v203_v48 = vld [vmem:[%s952_s3 + $0x80] sm:$0xff]  ;;  %v204_v49 = vld [vmem:[%s952_s3 + $0x88] sm:$0xff]  ;;  %v205_v51 = vld [vmem:[%s952_s3 + $0x90] sm:$0xff] }
   0xe   :  { %586 = vmatprep.subr.bf16.mxu1 %v708_v2  ;;  %v605_v50 = vpack.c.bf16 %v204_v49, %v203_v48  ;;  %v206_v52 = vld [vmem:[%s952_s3 + $0x98] sm:$0xff]  ;;  %v207_v54 = vld [vmem:[%s952_s3 + $0xa0] sm:$0xff]  ;;  %v208_v55 = vld [vmem:[%s952_s3 + $0xa8] sm:$0xff] }
   0xf   :  { %153 = vmatpush1.bf16.msra.mxu0 %v685_v9  ;;  %v608_v53 = vpack.c.bf16 %v206_v52, %v205_v51  ;;  %v611_v56 = vpack.c.bf16 %v208_v55, %v207_v54  ;;  %v209_v57 = vld [vmem:[%s952_s3 + $0xb0] sm:$0xff]  ;;  %v210_v58 = vld [vmem:[%s952_s3 + $0xb8] sm:$0xff]  ;;  %v211_v60 = vld [vmem:[%s952_s3 + $0xc0] sm:$0xff] }
  0x10   :  { %154 = vmatprep.subr.bf16.mxu0 %v686_v10  ;;  %v614_v59 = vpack.c.bf16 %v210_v58, %v209_v57  ;;  %v212_v61 = vld [vmem:[%s952_s3 + $0xc8] sm:$0xff]  ;;  %v213_v63 = vld [vmem:[%s952_s3 + $0xd0] sm:$0xff]  ;;  %v214_v0 = vld [vmem:[%s952_s3 + $0xd8] sm:$0xff] }
  0x11   :  { %588 = vmatpush1.bf16.msra.mxu1 %v587_v26  ;;  %v617_v62 = vpack.c.bf16 %v212_v61, %v211_v60  ;;  %v620_v1 = vpack.c.bf16 %v214_v0, %v213_v63  ;;  %v215_v3 = vld [vmem:[%s952_s3 + $0xe0] sm:$0xff]  ;;  %v216_v4 = vld [vmem:[%s952_s3 + $0xe8] sm:$0xff]  ;;  %v217_v7 = vld [vmem:[%s952_s3 + $0xf0] sm:$0x3] }
  0x12   :  { %589 = vmatprep.subr.bf16.mxu1 %v708_v2  ;;  %v623_v5 = vpack.c.bf16 %v216_v4, %v215_v3  ;;  %v571_v8 = vld.sshfl [vmem:[%s953_s4] sm:$0x33 pattern:$0x76325410] }
  0x13   :  { %155 = vmatpush1.bf16.msra.mxu0 %v688_v19  ;;  %v305_v9 = vcombine.high %v571_v8, %v571_v8 }
  0x14   :  { %156 = vmatprep.subr.bf16.mxu0 %v689_v20 }
  0x15   :  { %591 = vmatpush1.bf16.msra.mxu1 %v590_v31 }
  0x16   :  { %592 = vmatprep.subr.bf16.mxu1 %v708_v2 }
  0x17   :  { %157 = vmatpush1.bf16.msra.mxu0 %v691_v24 }
  0x18   :  { %158 = vmatprep.subr.bf16.mxu0 %v692_v25 }
  0x19   :  { %594 = vmatpush1.bf16.msra.mxu1 %v593_v36 }
  0x1a   :  { %595 = vmatprep.subr.bf16.mxu1 %v708_v2 }
  0x1b   :  { %159 = vmatpush1.bf16.msra.mxu0 %v694_v29 }
  0x1c   :  { %160 = vmatprep.subr.bf16.mxu0 %v695_v30 }
  0x1d   :  { %597 = vmatpush1.bf16.msra.mxu1 %v596_v40 }
  0x1e   :  { %598 = vmatprep.subr.bf16.mxu1 %v708_v2 }
  0x1f   :  { %161 = vmatpush1.bf16.msra.mxu0 %v697_v34 }
  0x20   :  { %162 = vmatprep.subr.bf16.mxu0 %v698_v35 }
  0x21   :  { %600 = vmatpush1.bf16.msra.mxu1 %v599_v44 }
  0x22   :  { %601 = vmatprep.subr.bf16.mxu1 %v708_v2 }
  0x23   :  { %163 = vmatpush1.bf16.msra.mxu0 %v700_v39 }
  0x24   :  { %625 = vmatprep.subr.bf16.mxu0 %v708_v2 }
  0x25   :  { %603 = vmatpush1.bf16.msra.mxu1 %v602_v47 }
  0x26   :  { %179 = vmatmul.mubr.bf16.vlgmr.msra.gmra.mrb[0].mxu0 %v548_v43  ;;  %604 = vmatprep.subr.bf16.mxu1 %v708_v2 }
  0x27   :  { %627 = vmatpush1.bf16.msra.mxu0 %v581_v18 }
  0x28   :  { %628 = vmatprep.subr.bf16.mxu0 %v708_v2 }
  0x29   :  { %606 = vmatpush1.bf16.msra.mxu1 %v605_v50 }
  0x2a   :  { %607 = vmatprep.subr.bf16.mxu1 %v708_v2 }
  0x2b   :  { %630 = vmatpush1.bf16.msra.mxu0 %v584_v21 }
  0x2c   :  { %631 = vmatprep.subr.bf16.mxu0 %v708_v2 }
  0x2d   :  { %609 = vmatpush1.bf16.msra.mxu1 %v608_v53 }
  0x2e   :  { %610 = vmatprep.subr.bf16.mxu1 %v708_v2 }
  0x2f   :  { %633 = vmatpush1.bf16.msra.mxu0 %v587_v26 }
  0x30   :  { %634 = vmatprep.subr.bf16.mxu0 %v708_v2 }
  0x31   :  { %612 = vmatpush1.bf16.msra.mxu1 %v611_v56 }
  0x32   :  { %613 = vmatprep.subr.bf16.mxu1 %v708_v2 }
  0x33   :  { %636 = vmatpush1.bf16.msra.mxu0 %v590_v31 }
  0x34   :  { %637 = vmatprep.subr.bf16.mxu0 %v708_v2 }
  0x35   :  { %615 = vmatpush1.bf16.msra.mxu1 %v614_v59 }
  0x36   :  { %616 = vmatprep.subr.bf16.mxu1 %v708_v2 }
  0x37   :  { %639 = vmatpush1.bf16.msra.mxu0 %v593_v36 }
  0x38   :  { %640 = vmatprep.subr.bf16.mxu0 %v708_v2 }
  0x39   :  { %618 = vmatpush1.bf16.msra.mxu1 %v617_v62 }
  0x3a   :  { %619 = vmatprep.subr.bf16.mxu1 %v708_v2 }
  0x3b   :  { %642 = vmatpush1.bf16.msra.mxu0 %v596_v40 }
  0x3c   :  { %643 = vmatprep.subr.bf16.mxu0 %v708_v2 }
  0x3d   :  { %621 = vmatpush1.bf16.msra.mxu1 %v620_v1 }
  0x3e   :  { %622 = vmatprep.subr.bf16.mxu1 %v708_v2 }
  0x3f   :  { %645 = vmatpush1.bf16.msra.mxu0 %v599_v44 }
  0x40   :  { %646 = vmatprep.subr.bf16.mxu0 %v708_v2 }
  0x41   :  { %624 = vmatpush1.bf16.msra.mxu1 %v623_v5 }
  0x42   :  { %287 = vmatprep.subr.mxu1 %v709_v6 }
  0x43   :  { %648 = vmatpush1.bf16.msra.mxu0 %v602_v47 }
  0x44   :  { %649 = vmatprep.subr.bf16.mxu0 %v708_v2 }
  0x45   :  { %569 = vmatpush1.msk.msra.mxu1 %vm223_vm1, %v217_v7 }
  0x46   :  { %572 = vmatprep.subr.msk.mxu1 %vm223_vm1, %v305_v9 }
  0x47   :  { %651 = vmatpush1.bf16.msra.mxu0 %v605_v50 }
  0x48   :  { %652 = vmatprep.subr.bf16.mxu0 %v708_v2 }
  0x4b   :  { %654 = vmatpush1.bf16.msra.mxu0 %v608_v53 }
  0x4c   :  { %655 = vmatprep.subr.bf16.mxu0 %v708_v2 }
  0x4f   :  { %657 = vmatpush1.bf16.msra.mxu0 %v611_v56 }
  0x50   :  { %658 = vmatprep.subr.bf16.mxu0 %v708_v2 }
  0x53   :  { %660 = vmatpush1.bf16.msra.mxu0 %v614_v59 }
  0x54   :  { %661 = vmatprep.subr.bf16.mxu0 %v708_v2 }
  0x57   :  { %663 = vmatpush1.bf16.msra.mxu0 %v617_v62 }
  0x58   :  { %664 = vmatprep.subr.bf16.mxu0 %v708_v2 }
  0x5b   :  { %666 = vmatpush1.bf16.msra.mxu0 %v620_v1 }
  0x5c   :  { %667 = vmatprep.subr.bf16.mxu0 %v708_v2 }
  0x5f   :  { %669 = vmatpush1.bf16.msra.mxu0 %v623_v5 }
  0x60   :  { %452 = vmatprep.subr.mxu0 %v709_v6 }
  0x63   :  { %575 = vmatpush1.msk.msra.mxu0 %vm223_vm1, %v217_v7 }
  0x85   :  { %v44_v2 = vpop.permute.xlu0 %43 }
  0xf9   :  { %v180_v10 = vpop.f32.mrb[0].mxu0 }
  0xfa   :  { %v182_v11 = vpop.f32.mrb[1].mxu0  ;;  %v181_v14 = vadd.f32 %v180_v10, %v44_v2 }
  0xfb   :  { %v183_v12 = vadd.f32 %v182_v11, %v44_v2  ;;  %v184_v13 = vpop.f32.mrb[2].mxu0 }
  0xfc   :  { %v185_v15 = vpop.f32.mrb[3].mxu0 }
  0xfd   :  { %570 = vmatprep.mubr.msk.f32.mxu1 %vm219_vm2, %v183_v12 }
  0xfe   :  { %292 = vmatmul.mubr.f32.vlgmr.msra.gmra.mrb[0].mxu1 %v181_v14 }
  0xff   :  { %573 = vmatpush1.msk.msra.mxu1 %vm223_vm1, %v571_v8  ;;  %378 = vmatprep.mubr.f32.mxu1 %v709_v6 }
 0x100   :  { %577 = vmatprep.subr.msk.mxu1 %vm223_vm1, %v305_v9 }
 0x1d1   :  { %v293_v16 = vpop.f32.mrb[0].mxu1 }
 0x1d2   :  { %v295_v17 = vpop.f32.mrb[1].mxu1  ;;  %574 = vmatmul.mubr.msk.f32.vlgmr.msra.gmra.mrb[2].mxu1 %vm306_vm3, %v293_v16 }
 0x1d3   :  { %578 = vmatpush1.msk.msra.mxu1 %vm223_vm1, %v571_v8  ;;  %529 = vmatprep.mubr.f32.mxu1 %v709_v6 }
 0x2a5   :  { %v380_v18 = vpop.f32.mrb[2].mxu1 }
 0x2a6   :  { %v385_v19 = vsub.f32 %v181_v14, %v380_v18  ;;  %v382_v20 = vpop.f32.mrb[3].mxu1 }
 0x2a7   :  { %v386_v21 = vsub.f32 %v183_v12, %v382_v20 }
 0x2a8   :  { %v387_v23 = vmul.f32 %v385_v19, %v385_v19 }
 0x2a9   :  { %v388_v22 = vmul.f32 %v386_v21, %v386_v21 }
 0x2ab   :  { %576 = vmatprep.mubr.msk.f32.mxu0 %vm219_vm2, %v388_v22 }
 0x2ac   :  { %457 = vmatmul.mubr.f32.vlgmr.msra.gmra.mrb[4].mxu0 %v387_v23 }
 0x37f   :  { %v458_v24 = vpop.f32.mrb[4].mxu0 }
 0x380   :  { %v460_v25 = vpop.f32.mrb[5].mxu0  ;;  %579 = vmatmul.mubr.msk.f32.vlgmr.msra.gmra.mrb[4].mxu1 %vm306_vm3, %v458_v24 }
 0x453   :  { %v531_v26 = vpop.f32.mrb[4].mxu1 }
 0x454   :  { %v532_v27 = vadd.f32 1e-05, %v531_v26  ;;  %v533_v28 = vpop.f32.mrb[5].mxu1 }
 0x455   :  { %v534_v29 = vadd.f32 1e-05, %v533_v28 }
 0x456   :  { %703 = vrsqrt.f32 %v532_v27 }
 0x457   :  { %705 = vrsqrt.f32 %v534_v29 }
 0x460   :  { %v704_v30 = vpop.eup %703 }
 0x461   :  { %v706_v31 = vpop.eup %705  ;;  %v538_v32 = vmul.f32 %v704_v30, %v385_v19 }
 0x462   :  { %v539_v33 = vmul.f32 %v706_v31, %v386_v21 }
 0x463   :  { %v540_v34 = vmax.f32 %v538_v32, 0.0 }
 0x464   :  { %v541_v35 = vmax.f32 %v539_v33, 0.0 }
 0x465   :  { %542 = vst [vmem:[%s954_s5] sm:$0xff] %v540_v34 }
 0x466   :  { %543 = vst.msk [vmem:[%s954_s5 + $0x8] sm:$0xff] %vm219_vm2, %v541_v35 }

// kernel: generator_forward.27
= control target key start
LH: loop header
LB: loop body
LE: loop exit
PB: predicated region body
PF: predicated region fallthrough
CT: control target
= control target key end

     0   :  { %v865_v1 = vmov 0   ;;  %v866_v37 = vmov 1983009808   ;;  %v99_v39 = vlaneseq  ;;  %vm473_vm0 = vcmask 261120   ;;  %s1127_s0 = inlined_call_operand.vmem [shape: bf16[288,512], index: 0, kind: input, shape index: {}]   ;;  %s1128_s1 = inlined_call_operand.vmem [shape: bf16[4,288], index: 1, kind: input, shape index: {}]   ;;  %s1129_s2 = inlined_call_operand.vmem [shape: f32[4,1], index: 2, kind: input, shape index: {}]   ;;  %s1130_s3 = inlined_call_operand.vmem [shape: f32[4,512], index: 3, kind: output, shape index: {}]  }
   0x1   :  { %v748_v0 = vld [vmem:[%s1127_s0 + $0x4] ss:$16 sps:$4 sm:$0xff]   ;;  %747 = vset.pattern.permute.xlu0 %v865_v1  ;;  %v750_v2 = vld [vmem:[%s1127_s0 + $0xc] ss:$16 sps:$4 sm:$0xff]   ;;  %v752_v3 = vld [vmem:[%s1127_s0] ss:$16 sps:$4 sm:$0xff]   ;;  %v97_v38 = vunpack.c.l.s4 %v866_v37 }
   0x2   :  { %477 = vmatprep.subr.bf16.mxu0 %v748_v0  ;;  %v753_v4 = vld [vmem:[%s1127_s0 + $0x8] ss:$16 sps:$4 sm:$0xff]   ;;  %559 = vmatprep.subr.bf16.mxu1 %v750_v2  ;;  %v754_v5 = vld [vmem:[%s1127_s0 + $0x24] ss:$16 sps:$4 sm:$0xff]   ;;  %v756_v6 = vld [vmem:[%s1127_s0 + $0x2c] ss:$16 sps:$4 sm:$0xff]  }
   0x3   :  { %478 = vmatpush1.bf16.msra.mxu0 %v752_v3  ;;  %560 = vmatpush1.bf16.msra.mxu1 %v753_v4  ;;  %v758_v7 = vld [vmem:[%s1127_s0 + $0x20] ss:$16 sps:$4 sm:$0xff]   ;;  %v759_v8 = vld [vmem:[%s1127_s0 + $0x28] ss:$16 sps:$4 sm:$0xff]   ;;  %v760_v9 = vld [vmem:[%s1127_s0 + $0x44] ss:$16 sps:$4 sm:$0xff]   ;;  %v98_v43 = vunpack.c.0.s8 %v97_v38 }
   0x4   :  { %479 = vmatprep.subr.bf16.mxu0 %v754_v5  ;;  %561 = vmatprep.subr.bf16.mxu1 %v756_v6  ;;  %v762_v10 = vld [vmem:[%s1127_s0 + $0x4c] ss:$16 sps:$4 sm:$0xff]   ;;  %v764_v11 = vld [vmem:[%s1127_s0 + $0x40] ss:$16 sps:$4 sm:$0xff]   ;;  %v765_v12 = vld [vmem:[%s1127_s0 + $0x48] ss:$16 sps:$4 sm:$0xff]  }
   0x5   :  { %v766_v13 = vld [vmem:[%s1127_s0 + $0x64] ss:$16 sps:$4 sm:$0xff]   ;;  %v768_v14 = vld [vmem:[%s1127_s0 + $0x6c] ss:$16 sps:$4 sm:$0xff]   ;;  %v770_v15 = vld [vmem:[%s1127_s0 + $0x60] ss:$16 sps:$4 sm:$0xff]  }
   0x6   :  { %v771_v16 = vld [vmem:[%s1127_s0 + $0x68] ss:$16 sps:$4 sm:$0xff]   ;;  %v772_v17 = vld [vmem:[%s1127_s0 + $0x84] ss:$16 sps:$4 sm:$0xff]   ;;  %v774_v18 = vld [vmem:[%s1127_s0 + $0x8c] ss:$16 sps:$4 sm:$0xff]  }
   0x7   :  { %480 = vmatpush1.bf16.msra.mxu0 %v758_v7  ;;  %562 = vmatpush1.bf16.msra.mxu1 %v759_v8  ;;  %v776_v19 = vld [vmem:[%s1127_s0 + $0x80] ss:$16 sps:$4 sm:$0xff]   ;;  %v777_v20 = vld [vmem:[%s1127_s0 + $0x88] ss:$16 sps:$4 sm:$0xff]   ;;  %v778_v21 = vld [vmem:[%s1127_s0 + $0xa4] ss:$16 sps:$4 sm:$0xff]  }
   0x8   :  { %481 = vmatprep.subr.bf16.mxu0 %v760_v9  ;;  %563 = vmatprep.subr.bf16.mxu1 %v762_v10  ;;  %v780_v22 = vld [vmem:[%s1127_s0 + $0xac] ss:$16 sps:$4 sm:$0xff]   ;;  %v782_v23 = vld [vmem:[%s1127_s0 + $0xa0] ss:$16 sps:$4 sm:$0xff]   ;;  %v783_v24 = vld [vmem:[%s1127_s0 + $0xa8] ss:$16 sps:$4 sm:$0xff]  }
   0x9   :  { %v784_v25 = vld [vmem:[%s1127_s0 + $0xc4] ss:$16 sps:$4 sm:$0xff]   ;;  %v786_v26 = vld [vmem:[%s1127_s0 + $0xcc] ss:$16 sps:$4 sm:$0xff]   ;;  %v788_v27 = vld [vmem:[%s1127_s0 + $0xc0] ss:$16 sps:$4 sm:$0xff]  }
   0xa   :  { %v789_v28 = vld [vmem:[%s1127_s0 + $0xc8] ss:$16 sps:$4 sm:$0xff]   ;;  %v790_v29 = vld [vmem:[%s1127_s0 + $0xe4] ss:$16 sps:$4 sm:$0xff]   ;;  %v792_v30 = vld [vmem:[%s1127_s0 + $0xec] ss:$16 sps:$4 sm:$0xff]  }
   0xb   :  { %482 = vmatpush1.bf16.msra.mxu0 %v764_v11  ;;  %564 = vmatpush1.bf16.msra.mxu1 %v765_v12  ;;  %v794_v31 = vld [vmem:[%s1127_s0 + $0xe0] ss:$16 sps:$4 sm:$0xff]   ;;  %v795_v32 = vld [vmem:[%s1127_s0 + $0xe8] ss:$16 sps:$4 sm:$0xff]   ;;  %v796_v33 = vld [vmem:[%s1127_s0 + $0x104] ss:$16 sps:$4 sm:$0xff]  }
   0xc   :  { %483 = vmatprep.subr.bf16.mxu0 %v766_v13  ;;  %565 = vmatprep.subr.bf16.mxu1 %v768_v14  ;;  %v798_v34 = vld [vmem:[%s1127_s0 + $0x10c] ss:$16 sps:$4 sm:$0xff]   ;;  %v800_v35 = vld [vmem:[%s1127_s0 + $0x100] ss:$16 sps:$4 sm:$0xff]   ;;  %v801_v36 = vld [vmem:[%s1127_s0 + $0x108] ss:$16 sps:$4 sm:$0xff]  }
   0xd   :  { %v802_v40 = vld [vmem:[%s1127_s0 + $0x124] ss:$16 sps:$4 sm:$0xff]   ;;  %v804_v41 = vld [vmem:[%s1127_s0 + $0x12c] ss:$16 sps:$4 sm:$0xff]   ;;  %v806_v42 = vld [vmem:[%s1127_s0 + $0x120] ss:$16 sps:$4 sm:$0xff]  }
   0xe   :  { %v100_v44 = vshrl.u32 %v99_v39, 7  ;;  %v807_v45 = vld [vmem:[%s1127_s0 + $0x128] ss:$16 sps:$4 sm:$0xff]   ;;  %v808_v46 = vld [vmem:[%s1127_s0 + $0x144] ss:$16 sps:$4 sm:$0xff]  }
   0xf   :  { %484 = vmatpush1.bf16.msra.mxu0 %v770_v15  ;;  %566 = vmatpush1.bf16.msra.mxu1 %v771_v16  ;;  %v810_v47 = vld [vmem:[%s1127_s0 + $0x14c] ss:$16 sps:$4 sm:$0xff]   ;;  %v812_v48 = vld [vmem:[%s1127_s0 + $0x140] ss:$16 sps:$4 sm:$0xff]   ;;  %v813_v49 = vld [vmem:[%s1127_s0 + $0x148] ss:$16 sps:$4 sm:$0xff]  }
  0x10   :  { %485 = vmatprep.subr.bf16.mxu0 %v772_v17  ;;  %567 = vmatprep.subr.bf16.mxu1 %v774_v18  ;;  %v1020_v50 = vsub.s32 %v98_v43, %v100_v44  ;;  %v814_v51 = vld [vmem:[%s1127_s0 + $0x164] ss:$16 sps:$4 sm:$0xff]   ;;  %v816_v52 = vld [vmem:[%s1127_s0 + $0x16c] ss:$16 sps:$4 sm:$0xff]   ;;  %v818_v54 = vld [vmem:[%s1127_s0 + $0x160] ss:$16 sps:$4 sm:$0xff]  }
  0x11   :  { %v1031_v53 = vld [vmem:[%s1128_s1] sm:$0x3f]  ;;  %v819_v56 = vld [vmem:[%s1127_s0 + $0x168] ss:$16 sps:$4 sm:$0xff]   ;;  %v822_v58 = vld [vmem:[%s1127_s0 + $0x18c] ss:$16 sps:$4 sm:$0xff]  }
  0x12   :  { %v102_v55 = vrot.slane %v1031_v53, %v1020_v50  ;;  %v820_v57 = vld [vmem:[%s1127_s0 + $0x184] ss:$16 sps:$4 sm:$0xff]   ;;  %v824_v60 = vld [vmem:[%s1127_s0 + $0x180] ss:$16 sps:$4 sm:$0xff]   ;;  %v825_v61 = vld [vmem:[%s1127_s0 + $0x188] ss:$16 sps:$4 sm:$0xff]  }
  0x13   :  { %486 = vmatpush1.bf16.msra.mxu0 %v776_v19  ;;  %568 = vmatpush1.bf16.msra.mxu1 %v777_v20  ;;  %v88_v62 = vld [vmem:[%s1129_s2] sm:$0xf]  ;;  %v826_v63 = vld [vmem:[%s1127_s0 + $0x1a4] ss:$16 sps:$4 sm:$0xff]   ;;  %v828_v0 = vld [vmem:[%s1127_s0 + $0x1ac] ss:$16 sps:$4 sm:$0xff]   ;;  %v95_v20 = vcombine.high %v1031_v53, %v1031_v53 }
  0x14   :  { %487 = vmatprep.subr.bf16.mxu0 %v778_v21  ;;  %569 = vmatprep.subr.bf16.mxu1 %v780_v22  ;;  %v110_v59 = vcombine.high %v102_v55, %v102_v55  ;;  %v830_v2 = vld [vmem:[%s1127_s0 + $0x1a0] ss:$16 sps:$4 sm:$0xff]   ;;  %v831_v3 = vld [vmem:[%s1127_s0 + $0x1a8] ss:$16 sps:$4 sm:$0xff]   ;;  %v832_v4 = vld [vmem:[%s1127_s0 + $0x1c4] ss:$16 sps:$4 sm:$0xff]  }
  0x15   :  { %91 = vperm.xlu0 %747, %v88_v62   ;;  %v834_v5 = vld [vmem:[%s1127_s0 + $0x1cc] ss:$16 sps:$4 sm:$0xff]   ;;  %v836_v6 = vld [vmem:[%s1127_s0 + $0x1c0] ss:$16 sps:$4 sm:$0xff]   ;;  %v837_v7 = vld [vmem:[%s1127_s0 + $0x1c8] ss:$16 sps:$4 sm:$0xff]   ;;  %v109_v21 = vrot.slane %v95_v20, %v1020_v50 }
  0x16   :  { %509 = vmatprep.mubr.bf16.mxu0 %v110_v59  ;;  %591 = vmatprep.mubr.bf16.mxu1 %v110_v59  ;;  %v838_v8 = vld [vmem:[%s1127_s0 + $0x1e4] ss:$16 sps:$4 sm:$0xff]   ;;  %v840_v9 = vld [vmem:[%s1127_s0 + $0x1ec] ss:$16 sps:$4 sm:$0xff]   ;;  %v842_v10 = vld [vmem:[%s1127_s0 + $0x1e0] ss:$16 sps:$4 sm:$0xff]  }
  0x17   :  { %488 = vmatpush1.bf16.msra.mxu0 %v782_v23  ;;  %570 = vmatpush1.bf16.msra.mxu1 %v783_v24  ;;  %v843_v11 = vld [vmem:[%s1127_s0 + $0x1e8] ss:$16 sps:$4 sm:$0xff]   ;;  %v847_v12 = vld [vmem:[%s1127_s0 + $0x204] ss:$16 sps:$4 sm:$0xff]   ;;  %v850_v13 = vld [vmem:[%s1127_s0 + $0x20c] ss:$16 sps:$4 sm:$0xff]  }
  0x18   :  { %489 = vmatprep.subr.bf16.mxu0 %v784_v25  ;;  %571 = vmatprep.subr.bf16.mxu1 %v786_v26  ;;  %v845_v14 = vld [vmem:[%s1127_s0 + $0x200] ss:$16 sps:$4 sm:$0xff]   ;;  %v848_v15 = vld [vmem:[%s1127_s0 + $0x208] ss:$16 sps:$4 sm:$0xff]   ;;  %v853_v16 = vld [vmem:[%s1127_s0 + $0x224] ss:$16 sps:$4 sm:$0xff]  }
  0x19   :  { %v856_v17 = vld [vmem:[%s1127_s0 + $0x22c] ss:$16 sps:$4 sm:$0xff]   ;;  %v851_v18 = vld [vmem:[%s1127_s0 + $0x220] ss:$16 sps:$4 sm:$0xff]   ;;  %v854_v19 = vld [vmem:[%s1127_s0 + $0x228] ss:$16 sps:$4 sm:$0xff]  }
  0x1b   :  { %490 = vmatpush1.bf16.msra.mxu0 %v788_v27  ;;  %572 = vmatpush1.bf16.msra.mxu1 %v789_v28 }
  0x1c   :  { %491 = vmatprep.subr.bf16.mxu0 %v790_v29  ;;  %573 = vmatprep.subr.bf16.mxu1 %v792_v30 }
  0x1f   :  { %492 = vmatpush1.bf16.msra.mxu0 %v794_v31  ;;  %574 = vmatpush1.bf16.msra.mxu1 %v795_v32 }
  0x20   :  { %493 = vmatprep.subr.bf16.mxu0 %v796_v33  ;;  %575 = vmatprep.subr.bf16.mxu1 %v798_v34 }
  0x23   :  { %494 = vmatpush1.bf16.msra.mxu0 %v800_v35  ;;  %576 = vmatpush1.bf16.msra.mxu1 %v801_v36 }
  0x24   :  { %495 = vmatprep.subr.bf16.mxu0 %v802_v40  ;;  %577 = vmatprep.subr.bf16.mxu1 %v804_v41 }
  0x27   :  { %496 = vmatpush1.bf16.msra.mxu0 %v806_v42  ;;  %578 = vmatpush1.bf16.msra.mxu1 %v807_v45 }
  0x28   :  { %497 = vmatprep.subr.bf16.mxu0 %v808_v46  ;;  %579 = vmatprep.subr.bf16.mxu1 %v810_v47 }
  0x2b   :  { %498 = vmatpush1.bf16.msra.mxu0 %v812_v48  ;;  %580 = vmatpush1.bf16.msra.mxu1 %v813_v49 }
  0x2c   :  { %499 = vmatprep.subr.bf16.mxu0 %v814_v51  ;;  %581 = vmatprep.subr.bf16.mxu1 %v816_v52 }
  0x2f   :  { %500 = vmatpush1.bf16.msra.mxu0 %v818_v54  ;;  %582 = vmatpush1.bf16.msra.mxu1 %v819_v56 }
  0x30   :  { %501 = vmatprep.subr.bf16.mxu0 %v820_v57  ;;  %583 = vmatprep.subr.bf16.mxu1 %v822_v58 }
  0x33   :  { %502 = vmatpush1.bf16.msra.mxu0 %v824_v60  ;;  %584 = vmatpush1.bf16.msra.mxu1 %v825_v61 }
  0x34   :  { %503 = vmatprep.subr.bf16.mxu0 %v826_v63  ;;  %585 = vmatprep.subr.bf16.mxu1 %v828_v0 }
  0x37   :  { %504 = vmatpush1.bf16.msra.mxu0 %v830_v2  ;;  %586 = vmatpush1.bf16.msra.mxu1 %v831_v3 }
  0x38   :  { %505 = vmatprep.subr.bf16.mxu0 %v832_v4  ;;  %587 = vmatprep.subr.bf16.mxu1 %v834_v5 }
  0x3b   :  { %506 = vmatpush1.bf16.msra.mxu0 %v836_v6  ;;  %588 = vmatpush1.bf16.msra.mxu1 %v837_v7 }
  0x3c   :  { %507 = vmatprep.subr.bf16.mxu0 %v838_v8  ;;  %589 = vmatprep.subr.bf16.mxu1 %v840_v9 }
  0x3f   :  { %508 = vmatpush1.bf16.msra.mxu0 %v842_v10  ;;  %590 = vmatpush1.bf16.msra.mxu1 %v843_v11 }
  0x40   :  { %518 = vmatprep.subr.bf16.mxu0 %v847_v12  ;;  %600 = vmatprep.subr.bf16.mxu1 %v850_v13 }
  0x42   :  { %510 = vmatmul.mubr.bf16.vlgmr.msra.gmra.mrb[0].mxu0 %v102_v55  ;;  %592 = vmatmul.mubr.bf16.vlgmr.msra.gmra.mrb[0].mxu1 %v102_v55 }
  0x43   :  { %519 = vmatpush1.bf16.msra.mxu0 %v845_v14  ;;  %601 = vmatpush1.bf16.msra.mxu1 %v848_v15 }
  0x44   :  { %520 = vmatprep.subr.bf16.mxu0 %v853_v16  ;;  %602 = vmatprep.subr.bf16.mxu1 %v856_v17 }
  0x45   :  { %550 = vmatprep.mubr.bf16.mxu0 %v865_v1  ;;  %632 = vmatprep.mubr.bf16.mxu1 %v865_v1 }
  0x47   :  { %521 = vmatpush1.bf16.msra.mxu0 %v851_v18  ;;  %603 = vmatpush1.bf16.msra.mxu1 %v854_v19 }
  0x4e   :  { %731 = vmatmul.mubr.msk.bf16.vlgmr.msra.gmra.mrb[0].mxu0 %vm473_vm0, %v109_v21  ;;  %732 = vmatmul.mubr.msk.bf16.vlgmr.msra.gmra.mrb[0].mxu1 %vm473_vm0, %v109_v21 }
  0x94   :  { %v92_v22 = vpop.permute.xlu0 %91 }
 0x121   :  { %v552_v23 = vpop.f32.mrb[0].mxu0  ;;  %v634_v24 = vpop.f32.mrb[0].mxu1 }
 0x122   :  { %v733_v25 = vadd.f32 %v552_v23, %v92_v22  ;;  %v735_v26 = vadd.f32 %v634_v24, %v92_v22  ;;  %v554_v27 = vpop.f32.mrb[1].mxu0  ;;  %v636_v28 = vpop.f32.mrb[1].mxu1 }
 0x123   :  { %v734_v29 = vadd.f32 %v554_v27, %v92_v22  ;;  %v736_v30 = vadd.f32 %v636_v28, %v92_v22  ;;  %v556_v1 = vpop.f32.mrb[2].mxu0  ;;  %v638_v31 = vpop.f32.mrb[2].mxu1 }
 0x124   :  { %857 = vtanh.f32 %v733_v25  ;;  %v557_v32 = vpop.f32.mrb[3].mxu0  ;;  %v639_v33 = vpop.f32.mrb[3].mxu1 }
 0x125   :  { %859 = vtanh.f32 %v735_v26 }
 0x126   :  { %861 = vtanh.f32 %v734_v29 }
 0x127   :  { %863 = vtanh.f32 %v736_v30 }
 0x12e   :  { %v858_v34 = vpop.eup %857 }
 0x12f   :  { %v860_v35 = vpop.eup %859 }
 0x130   :  { %v862_v36 = vpop.eup %861 }
 0x131   :  { %v864_v37 = vpop.eup %863  ;;  %v649_v38 = vcombine.low %v858_v34, %v862_v36 }
 0x132   :  { %v650_v39 = vcombine.low %v860_v35, %v864_v37 }
 0x133   :  { %653 = vst [vmem:[%s1130_s3] sm:$0xff] %v649_v38 }
 0x134   :  { %654 = vst [vmem:[%s1130_s3 + $0x8] sm:$0xff] %v650_v39 }

</bundles_post_ra>
